<compile_context>
chip_gen: v6e
topology: v6e:2x2x1
jax: 0.10.0
libtpu: 0.0.40
codegen_flags: <defaults>
</compile_context>

<pallas_src>
import functools

import jax
import jax.numpy as jnp
from jax.experimental import pallas as pl
from jax.experimental.pallas import tpu as pltpu


def _round_up(x, m):
    return (x + m - 1) // m * m


# ---------------------------------------------------------------------------
# Tiled matmul kernels (STFT basis / LSTM input projection)
# ---------------------------------------------------------------------------

def _matmul_kernel(x_ref, w_ref, o_ref):
    o_ref[...] = jnp.dot(x_ref[...].astype(jnp.bfloat16), w_ref[...],
                         preferred_element_type=jnp.float32)


def _matmul_bias_kernel(x_ref, w_ref, b_ref, o_ref):
    o_ref[...] = (jnp.dot(x_ref[...].astype(jnp.bfloat16), w_ref[...],
                          preferred_element_type=jnp.float32)
                  + b_ref[...])


def _tiled_matmul(x, w, bias=None, tile_m=512):
    # x: (M, K) f32, w: (K, N) bf16, bias: (1, N) f32 or None -> (M, N) f32.
    # Rows are tiled with a "parallel" grid so the HBM loads pipeline under the
    # matmul and (on v7x) the two TensorCores split the row tiles. tile_m=512
    # keeps double-buffered tiles well under v7x's 64 MiB VMEM.
    M, K = x.shape
    N = w.shape[1]
    TM = min(tile_m, _round_up(M, 8))
    Mp = _round_up(M, TM)
    if Mp != M:
        x = jnp.pad(x, ((0, Mp - M), (0, 0)))
    grid = (Mp // TM,)
    x_spec = pl.BlockSpec((TM, K), lambda i: (i, 0))
    w_spec = pl.BlockSpec((K, N), lambda i: (0, 0))
    o_spec = pl.BlockSpec((TM, N), lambda i: (i, 0))
    cp = pltpu.CompilerParams(dimension_semantics=("parallel",))
    if bias is None:
        out = pl.pallas_call(
            _matmul_kernel,
            out_shape=jax.ShapeDtypeStruct((Mp, N), jnp.float32),
            grid=grid, in_specs=[x_spec, w_spec], out_specs=o_spec,
            compiler_params=cp)(x, w)
    else:
        b_spec = pl.BlockSpec((1, N), lambda i: (0, 0))
        out = pl.pallas_call(
            _matmul_bias_kernel,
            out_shape=jax.ShapeDtypeStruct((Mp, N), jnp.float32),
            grid=grid, in_specs=[x_spec, w_spec, b_spec], out_specs=o_spec,
            compiler_params=cp)(x, w, bias)
    return out[:M]


# ---------------------------------------------------------------------------
# Fused bidirectional LSTM layer kernel
# ---------------------------------------------------------------------------

def _bilstm_kernel(gxf_ref, gxb_ref, whh_ref, outf_ref, outb_ref,
                   h_scr, c_scr, *, KT, H, n_pad):
    # gx*_ref : (KT, B, 8H) precomputed x@W_ih + b, lanes = [fwd 4H | bwd 4H]
    #           gxf indexed forward in time, gxb indexed reversed (index_map).
    # whh_ref : (2, H, 4H) bf16 recurrent weights [fwd, bwd].
    # out*_ref: (1, B, KT*H) lane-folded hidden states for this time block.
    # h_scr/c_scr: (2, B, H) f32 state carried across grid steps.
    t_blk = pl.program_id(0)

    @pl.when(t_blk == 0)
    def _():
        h_scr[...] = jnp.zeros_like(h_scr)
        c_scr[...] = jnp.zeros_like(c_scr)

    whh_f = whh_ref[0]
    whh_b = whh_ref[1]
    h_f = h_scr[0]
    c_f = c_scr[0]
    h_b = h_scr[1]
    c_b = c_scr[1]

    def cell(gates, c_prev):
        # TODO(synk): gate extraction is a 16-lane slice of a 64-lane row; a
        # (4, B, H)-laid-out gate matmul would avoid the XLU lane shuffles.
        i = jax.nn.sigmoid(gates[:, 0 * H:1 * H])
        f = jax.nn.sigmoid(gates[:, 1 * H:2 * H])
        g = jnp.tanh(gates[:, 2 * H:3 * H])
        o = jax.nn.sigmoid(gates[:, 3 * H:4 * H])
        c_new = f * c_prev + i * g
        h_new = o * jnp.tanh(c_new)
        return h_new, c_new

    hs_f = []
    hs_b = []
    for k in range(KT):                       # unrolled, static addressing
        # ---- forward direction: global time = t_blk*KT + k -----------------
        gx_f = gxf_ref[k][:, :4 * H]
        rec_f = jnp.dot(h_f.astype(jnp.bfloat16), whh_f,
                        preferred_element_type=jnp.float32)
        h_f, c_f = cell(gx_f + rec_f, c_f)
        hs_f.append(h_f)

        # ---- backward direction: global time = Tp-1 - (t_blk*KT + k) -------
        gx_b = gxb_ref[KT - 1 - k][:, 4 * H:]
        rec_b = jnp.dot(h_b.astype(jnp.bfloat16), whh_b,
                        preferred_element_type=jnp.float32)
        h_b_new, c_b_new = cell(gx_b + rec_b, c_b)
        if k < n_pad:
            # First n_pad reversed steps are time-padding: keep state at zero
            # so the backward recurrence starts cleanly at the last real frame.
            valid = t_blk > 0
            h_b = jnp.where(valid, h_b_new, h_b)
            c_b = jnp.where(valid, c_b_new, c_b)
        else:
            h_b, c_b = h_b_new, c_b_new
        hs_b.append(h_b)

    # Single lane-dense (B, KT*H) store per direction per block.
    outf_ref[0] = jnp.concatenate(hs_f, axis=-1)
    outb_ref[0] = jnp.concatenate(hs_b[::-1], axis=-1)

    h_scr[0] = h_f
    c_scr[0] = c_f
    h_scr[1] = h_b
    c_scr[1] = c_b


def _bilstm_layer(h_tm, w_ih_both, b_both, whh_both, *, H, KT, T_valid):
    # h_tm: (Tp, B, D) time-major (Tp multiple of KT, zero-padded past T_valid)
    Tp, B, D = h_tm.shape
    NB = Tp // KT
    n_pad = Tp - T_valid

    # Hoisted input projection for BOTH directions: one big MXU matmul,
    # output is 8H = 128 lanes wide (lane-dense).
    gx = _tiled_matmul(h_tm.reshape(Tp * B, D), w_ih_both, b_both)
    gx = gx.reshape(Tp, B, 8 * H)

    kernel = functools.partial(_bilstm_kernel, KT=KT, H=H, n_pad=n_pad)
    outf, outb = pl.pallas_call(
        kernel,
        out_shape=(jax.ShapeDtypeStruct((NB, B, KT * H), jnp.float32),
                   jax.ShapeDtypeStruct((NB, B, KT * H), jnp.float32)),
        grid=(NB,),
        in_specs=[pl.BlockSpec((KT, B, 8 * H), lambda t: (t, 0, 0)),
                  pl.BlockSpec((KT, B, 8 * H), lambda t: (NB - 1 - t, 0, 0)),
                  pl.BlockSpec((2, H, 4 * H), lambda t: (0, 0, 0))],
        out_specs=(pl.BlockSpec((1, B, KT * H), lambda t: (t, 0, 0)),
                   pl.BlockSpec((1, B, KT * H), lambda t: (NB - 1 - t, 0, 0))),
        scratch_shapes=[pltpu.VMEM((2, B, H), jnp.float32),
                        pltpu.VMEM((2, B, H), jnp.float32)],
        compiler_params=pltpu.CompilerParams(
            dimension_semantics=("arbitrary",)),    # sequential recurrence
    )(gx, gx, whh_both)

    # Un-fold lanes back to (Tp, B, H) per direction (layout plumbing only).
    outf = outf.reshape(NB, B, KT, H).transpose(0, 2, 1, 3).reshape(Tp, B, H)
    outb = outb.reshape(NB, B, KT, H).transpose(0, 2, 1, 3).reshape(Tp, B, H)
    return jnp.concatenate([outf, outb], axis=-1)   # (Tp, B, 2H)


# ---------------------------------------------------------------------------
# Parameter construction (deterministic, synthetic)
# ---------------------------------------------------------------------------

def make_stft_basis(n_fft):
    # Windowed Fourier basis (conv1d weight of TrainableSTFTLayer):
    # (n_fft taps, n_fft outputs) with outputs = [real n_fft//2 | imag n_fft//2].
    k = jnp.arange(n_fft // 2, dtype=jnp.float32)
    n = jnp.arange(n_fft, dtype=jnp.float32)
    window = 0.5 - 0.5 * jnp.cos(2.0 * jnp.pi * n / n_fft)          # Hann
    ang = 2.0 * jnp.pi * jnp.outer(k, n) / n_fft
    cos_b = jnp.cos(ang) * window[None, :]
    sin_b = -jnp.sin(ang) * window[None, :]
    return jnp.concatenate([cos_b, sin_b], axis=0).T.astype(jnp.float32)


def make_block_stft_basis(basis, hop, group):
    # Block basis over (n_fft + (group-1)*hop) samples producing `group` frames
    # (group*n_fft = 128 output lanes) per MXU pass. Stored bf16 for the MXU.
    n_fft, n_out = basis.shape
    lw = n_fft + (group - 1) * hop
    lw_pad = _round_up(lw, 8)
    blocks = []
    for g in range(group):
        blk = jnp.zeros((lw_pad, n_out), jnp.float32)
        blk = blk.at[g * hop:g * hop + n_fft].set(basis)
        blocks.append(blk)
    return jnp.concatenate(blocks, axis=1).astype(jnp.bfloat16)


def make_lstm_params(key, n_lstm, input_size, hidden):
    # TODO(synk): init_lstm_weight's exact scheme not reproduced; deterministic
    # uniform(-1/sqrt(H), 1/sqrt(H)) init is used instead (synthetic weights).
    params = []
    H = hidden
    scale = 1.0 / float(H) ** 0.5
    for layer in range(n_lstm):
        d = input_size if layer == 0 else 2 * H
        w_ih_dirs, whh_dirs, b_dirs = [], [], []
        for _ in range(2):  # forward, backward
            key, k1, k2, k3, k4 = jax.random.split(key, 5)
            w_ih = jax.random.uniform(k1, (4 * H, d), jnp.float32, -scale, scale)
            w_hh = jax.random.uniform(k2, (4 * H, H), jnp.float32, -scale, scale)
            b_ih = jax.random.uniform(k3, (4 * H,), jnp.float32, -scale, scale)
            b_hh = jax.random.uniform(k4, (4 * H,), jnp.float32, -scale, scale)
            w_ih_dirs.append(w_ih.T)            # (d, 4H)
            whh_dirs.append(w_hh.T)             # (H, 4H)
            b_dirs.append(b_ih + b_hh)          # (4H,)
        w_ih_both = jnp.concatenate(w_ih_dirs, axis=1).astype(jnp.bfloat16)
        b_both = jnp.concatenate(b_dirs)[None, :].astype(jnp.float32)
        whh_both = jnp.stack(whh_dirs).astype(jnp.bfloat16)
        params.append((w_ih_both, b_both, whh_both))
    return params


# ---------------------------------------------------------------------------
# Forward pass (matches BaselineEncoder.forward)
# ---------------------------------------------------------------------------

@functools.partial(jax.jit, static_argnames=("n_fft", "hop", "hidden"))
def baseline_encoder_forward(x, stft_block_basis, lstm_params, *,
                             n_fft, hop, hidden):
    # x: (B, C, T) float32
    B, C, T = x.shape
    H = hidden
    pad = n_fft // 2
    lw_pad, ncols = stft_block_basis.shape
    G = ncols // n_fft                                    # frames per pass
    Kf = n_fft // 2

    # --- TrainableSTFTLayer: group-framing + tiled Pallas matmul -------------
    xp = jnp.pad(x.reshape(B * C, T), ((0, 0), (pad, pad)))
    L0 = xp.shape[-1]
    F = (L0 - n_fft) // hop + 1
    NG = -(-F // G)
    need = (NG - 1) * G * hop + lw_pad
    if need > L0:
        xp = jnp.pad(xp, ((0, 0), (0, need - L0)))
    # TODO(synk): the overlapping window gather (~1.4x dup) could be fused
    # into the kernel with in-kernel pl.ds reads of a contiguous signal tile.
    starts = jnp.arange(NG) * (G * hop)
    idx = starts[:, None] + jnp.arange(lw_pad)[None, :]
    rows = xp[:, idx].reshape(B * C * NG, lw_pad)         # (R, lw_pad)
    spec = _tiled_matmul(rows, stft_block_basis)          # (R, G*n_fft) f32
    spec = spec.reshape(B, C, NG * G, 2, Kf)[:, :, :F]    # (B, C, F, 2, Kf)
    X = jnp.transpose(spec, (0, 1, 3, 4, 2))              # (B, C, 2, Kf, F)

    # --- flatten(-4,-2).transpose(-1,-2): (B, F, C*n_fft) --------------------
    feat = jnp.transpose(spec, (0, 2, 1, 3, 4)).reshape(B, F, C * n_fft)
    h = jnp.transpose(feat, (1, 0, 2))                    # (F, B, D) time-major

    # --- bidirectional multi-layer LSTM (one fused Pallas kernel per layer) --
    KT = 8                                                # timesteps per grid step
    Tp = _round_up(F, KT)
    if Tp > F:
        h = jnp.pad(h, ((0, Tp - F), (0, 0), (0, 0)))
    for (w_ih_both, b_both, whh_both) in lstm_params:
        h = _bilstm_layer(h, w_ih_both, b_both, whh_both,
                          H=H, KT=KT, T_valid=F)          # (Tp, B, 2H)

    lstm_out = jnp.transpose(h[:F], (1, 2, 0))            # (B, lstm_channel, F)
    return lstm_out, X


# ---------------------------------------------------------------------------
# Demo
# ---------------------------------------------------------------------------

if __name__ == "__main__":
    in_channel = 2
    n_fft = 16
    hop = n_fft // 4
    n_lstm = 2
    lstm_channel = 32
    hidden = lstm_channel // 2
    stft_group = 8          # 8 frames x 16 outputs = 128 lane-dense columns

    key = jax.random.PRNGKey(0)
    kx, kp = jax.random.split(key)

    B, T = 2, 64
    x = jax.random.normal(kx, (B, in_channel, T), dtype=jnp.float32)

    basis = make_stft_basis(n_fft)
    stft_block_basis = make_block_stft_basis(basis, hop, stft_group)
    lstm_params = make_lstm_params(kp, n_lstm, n_fft * in_channel, hidden)

    lstm_out, X = baseline_encoder_forward(
        x, stft_block_basis, lstm_params, n_fft=n_fft, hop=hop, hidden=hidden)
    jax.block_until_ready((lstm_out, X))

    F = T // hop + 1
    assert X.shape == (B, in_channel, 2, n_fft // 2, F), X.shape
    assert lstm_out.shape == (B, lstm_channel, F), lstm_out.shape
    print("KERNEL_OK")
</pallas_src>

<mosaic_0001>
module attributes {stable_mosaic.version = 11 : i64} {
  func.func @_matmul_kernel(%arg0: i32, %arg1: memref<16x48xf32, #tpu.memory_space<vmem>>, %arg2: memref<48x128xbf16, #tpu.memory_space<vmem>>, %arg3: memref<16x128xf32, #tpu.memory_space<vmem>>) attributes {dimension_semantics = [#tpu.dimension_semantics<parallel>], iteration_bounds = array<i64: 1>, scalar_prefetch = 0 : i64, scratch_operands = 0 : i64, tpu.core_type = #tpu.core_type<tc>, window_params = [{transform_indices = @transform_0, window_bounds = array<i64: 16, 48>}, {pipeline_mode = #tpu.pipeline_mode<synchronous>, transform_indices = @transform_1, window_bounds = array<i64: 48, 128>}, {transform_indices = @transform_2, window_bounds = array<i64: 16, 128>}]} {
    %c0 = arith.constant 0 : index
    %c0_0 = arith.constant 0 : index
    %0 = vector.load %arg1[%c0, %c0_0] : memref<16x48xf32, #tpu.memory_space<vmem>>, vector<16x48xf32>
    %1 = arith.truncf %0 : vector<16x48xf32> to vector<16x48xbf16>
    %c0_1 = arith.constant 0 : index
    %c0_2 = arith.constant 0 : index
    %2 = vector.load %arg2[%c0_1, %c0_2] : memref<48x128xbf16, #tpu.memory_space<vmem>>, vector<48x128xbf16>
    %cst = arith.constant dense<0.000000e+00> : vector<16x128xf32>
    %3 = tpu.matmul %1, %2, %cst {dimension_numbers = #tpu.dot_dimension_numbers<[1], [0], [0], [1], [0, 0, 1, 1], [], []>} : vector<16x48xbf16>, vector<48x128xbf16>, vector<16x128xf32> -> vector<16x128xf32>
    %c0_3 = arith.constant 0 : index
    %c0_4 = arith.constant 0 : index
    %4 = vector.load %arg3[%c0_3, %c0_4] : memref<16x128xf32, #tpu.memory_space<vmem>>, vector<16x128xf32>
    tpu.vector_store %arg3[%c0_3, %c0_4], %3 {strides = array<i32>} : memref<16x128xf32, #tpu.memory_space<vmem>>, vector<16x128xf32>,
    return
  }
  func.func @transform_0(%arg0: i32) -> (i32, i32) {
    %c0_i32 = arith.constant 0 : i32
    %c0_i32_0 = arith.constant 0 : i32
    return %arg0, %c0_i32 : i32, i32
  }
  func.func @transform_1(%arg0: i32) -> (i32, i32) {
    %c0_i32 = arith.constant 0 : i32
    %c0_i32_0 = arith.constant 0 : i32
    %c0_i32_1 = arith.constant 0 : i32
    return %c0_i32, %c0_i32_0 : i32, i32
  }
  func.func @transform_2(%arg0: i32) -> (i32, i32) {
    %c0_i32 = arith.constant 0 : i32
    %c0_i32_0 = arith.constant 0 : i32
    return %arg0, %c0_i32 : i32, i32
  }
}

module attributes {stable_mosaic.version = 11 : i64} {
  func.func @_matmul_bias_kernel(%arg0: i32, %arg1: memref<48x32xf32, #tpu.memory_space<vmem>>, %arg2: memref<32x128xbf16, #tpu.memory_space<vmem>>, %arg3: memref<1x128xf32, #tpu.memory_space<vmem>>, %arg4: memref<48x128xf32, #tpu.memory_space<vmem>>) attributes {dimension_semantics = [#tpu.dimension_semantics<parallel>], iteration_bounds = array<i64: 1>, scalar_prefetch = 0 : i64, scratch_operands = 0 : i64, tpu.core_type = #tpu.core_type<tc>, window_params = [{transform_indices = @transform_0, window_bounds = array<i64: 48, 32>}, {pipeline_mode = #tpu.pipeline_mode<synchronous>, transform_indices = @transform_1, window_bounds = array<i64: 32, 128>}, {pipeline_mode = #tpu.pipeline_mode<synchronous>, transform_indices = @transform_2, window_bounds = array<i64: 1, 128>}, {transform_indices = @transform_3, window_bounds = array<i64: 48, 128>}]} {
    %c0 = arith.constant 0 : index
    %c0_0 = arith.constant 0 : index
    %0 = vector.load %arg1[%c0, %c0_0] : memref<48x32xf32, #tpu.memory_space<vmem>>, vector<48x32xf32>
    %1 = arith.truncf %0 : vector<48x32xf32> to vector<48x32xbf16>
    %c0_1 = arith.constant 0 : index
    %c0_2 = arith.constant 0 : index
    %2 = vector.load %arg2[%c0_1, %c0_2] : memref<32x128xbf16, #tpu.memory_space<vmem>>, vector<32x128xbf16>
    %cst = arith.constant dense<0.000000e+00> : vector<48x128xf32>
    %3 = tpu.matmul %1, %2, %cst {dimension_numbers = #tpu.dot_dimension_numbers<[1], [0], [0], [1], [0, 0, 1, 1], [], []>} : vector<48x32xbf16>, vector<32x128xbf16>, vector<48x128xf32> -> vector<48x128xf32>
    %c0_3 = arith.constant 0 : index
    %c0_4 = arith.constant 0 : index
    %4 = vector.load %arg3[%c0_3, %c0_4] : memref<1x128xf32, #tpu.memory_space<vmem>>, vector<1x128xf32>
    %5 = vector.broadcast %4 : vector<1x128xf32> to vector<48x128xf32>
    %6 = arith.addf %3, %5 : vector<48x128xf32>
    %c0_5 = arith.constant 0 : index
    %c0_6 = arith.constant 0 : index
    %7 = vector.load %arg4[%c0_5, %c0_6] : memref<48x128xf32, #tpu.memory_space<vmem>>, vector<48x128xf32>
    tpu.vector_store %arg4[%c0_5, %c0_6], %6 {strides = array<i32>} : memref<48x128xf32, #tpu.memory_space<vmem>>, vector<48x128xf32>,
    return
  }
  func.func @transform_0(%arg0: i32) -> (i32, i32) {
    %c0_i32 = arith.constant 0 : i32
    %c0_i32_0 = arith.constant 0 : i32
    return %arg0, %c0_i32 : i32, i32
  }
  func.func @transform_1(%arg0: i32) -> (i32, i32) {
    %c0_i32 = arith.constant 0 : i32
    %c0_i32_0 = arith.constant 0 : i32
    %c0_i32_1 = arith.constant 0 : i32
    return %c0_i32, %c0_i32_0 : i32, i32
  }
  func.func @transform_2(%arg0: i32) -> (i32, i32) {
    %c0_i32 = arith.constant 0 : i32
    %c0_i32_0 = arith.constant 0 : i32
    %c0_i32_1 = arith.constant 0 : i32
    return %c0_i32, %c0_i32_0 : i32, i32
  }
  func.func @transform_3(%arg0: i32) -> (i32, i32) {
    %c0_i32 = arith.constant 0 : i32
    %c0_i32_0 = arith.constant 0 : i32
    return %arg0, %c0_i32 : i32, i32
  }
}

module attributes {stable_mosaic.version = 11 : i64} {
  func.func @_bilstm_kernel(%arg0: i32, %arg1: memref<8x2x128xf32, #tpu.memory_space<vmem>>, %arg2: memref<8x2x128xf32, #tpu.memory_space<vmem>>, %arg3: memref<2x16x64xbf16, #tpu.memory_space<vmem>>, %arg4: memref<1x2x128xf32, #tpu.memory_space<vmem>>, %arg5: memref<1x2x128xf32, #tpu.memory_space<vmem>>, %arg6: memref<2x2x16xf32, #tpu.memory_space<vmem>>, %arg7: memref<2x2x16xf32, #tpu.memory_space<vmem>>) attributes {dimension_semantics = [#tpu.dimension_semantics<arbitrary>], iteration_bounds = array<i64: 3>, scalar_prefetch = 0 : i64, scratch_operands = 2 : i64, tpu.core_type = #tpu.core_type<tc>, window_params = [{transform_indices = @transform_0, window_bounds = array<i64: 8, 2, 128>}, {transform_indices = @transform_1, window_bounds = array<i64: 8, 2, 128>}, {pipeline_mode = #tpu.pipeline_mode<synchronous>, transform_indices = @transform_2, window_bounds = array<i64: 2, 16, 64>}, {transform_indices = @transform_3, window_bounds = array<i64: 1, 2, 128>}, {transform_indices = @transform_4, window_bounds = array<i64: 1, 2, 128>}]} {
    %c0_i32 = arith.constant 0 : i32
    %0 = arith.cmpi eq, %arg0, %c0_i32 : i32
    %1 = arith.extui %0 : i1 to i32
    %c0_i32_0 = arith.constant 0 : i32
    %2 = arith.cmpi ne, %1, %c0_i32_0 : i32
    scf.if %2 {
      %cst_147 = arith.constant 0.000000e+00 : f32
      %552 = vector.broadcast %cst_147 : f32 to vector<2x2x16xf32>
      %c0_148 = arith.constant 0 : index
      %c0_149 = arith.constant 0 : index
      %c0_150 = arith.constant 0 : index
      %553 = vector.load %arg6[%c0_148, %c0_149, %c0_150] : memref<2x2x16xf32, #tpu.memory_space<vmem>>, vector<2x2x16xf32>
      tpu.vector_store %arg6[%c0_148, %c0_149, %c0_150], %552 {strides = array<i32>} : memref<2x2x16xf32, #tpu.memory_space<vmem>>, vector<2x2x16xf32>,
      %cst_151 = arith.constant 0.000000e+00 : f32
      %554 = vector.broadcast %cst_151 : f32 to vector<2x2x16xf32>
      %c0_152 = arith.constant 0 : index
      %c0_153 = arith.constant 0 : index
      %c0_154 = arith.constant 0 : index
      %555 = vector.load %arg7[%c0_152, %c0_153, %c0_154] : memref<2x2x16xf32, #tpu.memory_space<vmem>>, vector<2x2x16xf32>
      tpu.vector_store %arg7[%c0_152, %c0_153, %c0_154], %554 {strides = array<i32>} : memref<2x2x16xf32, #tpu.memory_space<vmem>>, vector<2x2x16xf32>,
    } else {
    }
    %c0 = arith.constant 0 : index
    %c0_1 = arith.constant 0 : index
    %c0_2 = arith.constant 0 : index
    %3 = vector.load %arg3[%c0, %c0_1, %c0_2] : memref<2x16x64xbf16, #tpu.memory_space<vmem>>, vector<1x16x64xbf16>
    %4 = vector.shape_cast %3 : vector<1x16x64xbf16> to vector<16x64xbf16>
    %c1 = arith.constant 1 : index
    %c0_3 = arith.constant 0 : index
    %c0_4 = arith.constant 0 : index
    %5 = vector.load %arg3[%c1, %c0_3, %c0_4] : memref<2x16x64xbf16, #tpu.memory_space<vmem>>, vector<1x16x64xbf16>
    %6 = vector.shape_cast %5 : vector<1x16x64xbf16> to vector<16x64xbf16>
    %c0_5 = arith.constant 0 : index
    %c0_6 = arith.constant 0 : index
    %c0_7 = arith.constant 0 : index
    %7 = vector.load %arg6[%c0_5, %c0_6, %c0_7] : memref<2x2x16xf32, #tpu.memory_space<vmem>>, vector<1x2x16xf32>
    %8 = vector.shape_cast %7 : vector<1x2x16xf32> to vector<2x16xf32>
    %c0_8 = arith.constant 0 : index
    %c0_9 = arith.constant 0 : index
    %c0_10 = arith.constant 0 : index
    %9 = vector.load %arg7[%c0_8, %c0_9, %c0_10] : memref<2x2x16xf32, #tpu.memory_space<vmem>>, vector<1x2x16xf32>
    %10 = vector.shape_cast %9 : vector<1x2x16xf32> to vector<2x16xf32>
    %c1_11 = arith.constant 1 : index
    %c0_12 = arith.constant 0 : index
    %c0_13 = arith.constant 0 : index
    %11 = vector.load %arg6[%c1_11, %c0_12, %c0_13] : memref<2x2x16xf32, #tpu.memory_space<vmem>>, vector<1x2x16xf32>
    %12 = vector.shape_cast %11 : vector<1x2x16xf32> to vector<2x16xf32>
    %c1_14 = arith.constant 1 : index
    %c0_15 = arith.constant 0 : index
    %c0_16 = arith.constant 0 : index
    %13 = vector.load %arg7[%c1_14, %c0_15, %c0_16] : memref<2x2x16xf32, #tpu.memory_space<vmem>>, vector<1x2x16xf32>
    %14 = vector.shape_cast %13 : vector<1x2x16xf32> to vector<2x16xf32>
    %c0_17 = arith.constant 0 : index
    %c0_18 = arith.constant 0 : index
    %c0_19 = arith.constant 0 : index
    %15 = vector.load %arg1[%c0_17, %c0_18, %c0_19] : memref<8x2x128xf32, #tpu.memory_space<vmem>>, vector<1x2x128xf32>
    %16 = vector.shape_cast %15 : vector<1x2x128xf32> to vector<2x128xf32>
    %17 = vector.extract_strided_slice %16 {offsets = [0, 0], sizes = [2, 64], strides = [1, 1]} : vector<2x128xf32> to vector<2x64xf32>
    %18 = arith.truncf %8 : vector<2x16xf32> to vector<2x16xbf16>
    %cst = arith.constant dense<0.000000e+00> : vector<2x64xf32>
    %19 = tpu.matmul %18, %4, %cst {dimension_numbers = #tpu.dot_dimension_numbers<[1], [0], [0], [1], [0, 0, 1, 1], [], []>} : vector<2x16xbf16>, vector<16x64xbf16>, vector<2x64xf32> -> vector<2x64xf32>
    %20 = arith.addf %17, %19 : vector<2x64xf32>
    %21 = vector.extract_strided_slice %20 {offsets = [0, 0], sizes = [2, 16], strides = [1, 1]} : vector<2x64xf32> to vector<2x16xf32>
    %22 = arith.negf %21 : vector<2x16xf32>
    %23 = math.exp %22 : vector<2x16xf32>
    %cst_20 = arith.constant 1.000000e+00 : f32
    %24 = vector.broadcast %cst_20 : f32 to vector<2x16xf32>
    %25 = arith.addf %24, %23 : vector<2x16xf32>
    %26 = arith.divf %24, %25 : vector<2x16xf32>
    %27 = vector.extract_strided_slice %20 {offsets = [0, 16], sizes = [2, 16], strides = [1, 1]} : vector<2x64xf32> to vector<2x16xf32>
    %28 = arith.negf %27 : vector<2x16xf32>
    %29 = math.exp %28 : vector<2x16xf32>
    %cst_21 = arith.constant 1.000000e+00 : f32
    %30 = vector.broadcast %cst_21 : f32 to vector<2x16xf32>
    %31 = arith.addf %30, %29 : vector<2x16xf32>
    %32 = arith.divf %30, %31 : vector<2x16xf32>
    %33 = vector.extract_strided_slice %20 {offsets = [0, 32], sizes = [2, 16], strides = [1, 1]} : vector<2x64xf32> to vector<2x16xf32>
    %34 = math.tanh %33 : vector<2x16xf32>
    %35 = vector.extract_strided_slice %20 {offsets = [0, 48], sizes = [2, 16], strides = [1, 1]} : vector<2x64xf32> to vector<2x16xf32>
    %36 = arith.negf %35 : vector<2x16xf32>
    %37 = math.exp %36 : vector<2x16xf32>
    %cst_22 = arith.constant 1.000000e+00 : f32
    %38 = vector.broadcast %cst_22 : f32 to vector<2x16xf32>
    %39 = arith.addf %38, %37 : vector<2x16xf32>
    %40 = arith.divf %38, %39 : vector<2x16xf32>
    %41 = arith.mulf %32, %10 : vector<2x16xf32>
    %42 = arith.mulf %26, %34 : vector<2x16xf32>
    %43 = arith.addf %41, %42 : vector<2x16xf32>
    %44 = math.tanh %43 : vector<2x16xf32>
    %45 = arith.mulf %40, %44 : vector<2x16xf32>
    %c7 = arith.constant 7 : index
    %c0_23 = arith.constant 0 : index
    %c0_24 = arith.constant 0 : index
    %46 = vector.load %arg2[%c7, %c0_23, %c0_24] : memref<8x2x128xf32, #tpu.memory_space<vmem>>, vector<1x2x128xf32>
    %47 = vector.shape_cast %46 : vector<1x2x128xf32> to vector<2x128xf32>
    %48 = vector.extract_strided_slice %47 {offsets = [0, 64], sizes = [2, 64], strides = [1, 1]} : vector<2x128xf32> to vector<2x64xf32>
    %49 = arith.truncf %12 : vector<2x16xf32> to vector<2x16xbf16>
    %cst_25 = arith.constant dense<0.000000e+00> : vector<2x64xf32>
    %50 = tpu.matmul %49, %6, %cst_25 {dimension_numbers = #tpu.dot_dimension_numbers<[1], [0], [0], [1], [0, 0, 1, 1], [], []>} : vector<2x16xbf16>, vector<16x64xbf16>, vector<2x64xf32> -> vector<2x64xf32>
    %51 = arith.addf %48, %50 : vector<2x64xf32>
    %52 = vector.extract_strided_slice %51 {offsets = [0, 0], sizes = [2, 16], strides = [1, 1]} : vector<2x64xf32> to vector<2x16xf32>
    %53 = arith.negf %52 : vector<2x16xf32>
    %54 = math.exp %53 : vector<2x16xf32>
    %cst_26 = arith.constant 1.000000e+00 : f32
    %55 = vector.broadcast %cst_26 : f32 to vector<2x16xf32>
    %56 = arith.addf %55, %54 : vector<2x16xf32>
    %57 = arith.divf %55, %56 : vector<2x16xf32>
    %58 = vector.extract_strided_slice %51 {offsets = [0, 16], sizes = [2, 16], strides = [1, 1]} : vector<2x64xf32> to vector<2x16xf32>
    %59 = arith.negf %58 : vector<2x16xf32>
    %60 = math.exp %59 : vector<2x16xf32>
    %cst_27 = arith.constant 1.000000e+00 : f32
    %61 = vector.broadcast %cst_27 : f32 to vector<2x16xf32>
    %62 = arith.addf %61, %60 : vector<2x16xf32>
    %63 = arith.divf %61, %62 : vector<2x16xf32>
    %64 = vector.extract_strided_slice %51 {offsets = [0, 32], sizes = [2, 16], strides = [1, 1]} : vector<2x64xf32> to vector<2x16xf32>
    %65 = math.tanh %64 : vector<2x16xf32>
    %66 = vector.extract_strided_slice %51 {offsets = [0, 48], sizes = [2, 16], strides = [1, 1]} : vector<2x64xf32> to vector<2x16xf32>
    %67 = arith.negf %66 : vector<2x16xf32>
    %68 = math.exp %67 : vector<2x16xf32>
    %cst_28 = arith.constant 1.000000e+00 : f32
    %69 = vector.broadcast %cst_28 : f32 to vector<2x16xf32>
    %70 = arith.addf %69, %68 : vector<2x16xf32>
    %71 = arith.divf %69, %70 : vector<2x16xf32>
    %72 = arith.mulf %63, %14 : vector<2x16xf32>
    %73 = arith.mulf %57, %65 : vector<2x16xf32>
    %74 = arith.addf %72, %73 : vector<2x16xf32>
    %75 = math.tanh %74 : vector<2x16xf32>
    %76 = arith.mulf %71, %75 : vector<2x16xf32>
    %c0_i32_29 = arith.constant 0 : i32
    %77 = arith.cmpi sgt, %arg0, %c0_i32_29 : i32
    %78 = arith.select %77, %76, %12 : vector<2x16xf32>
    %79 = arith.select %77, %74, %14 : vector<2x16xf32>
    %c1_30 = arith.constant 1 : index
    %c0_31 = arith.constant 0 : index
    %c0_32 = arith.constant 0 : index
    %80 = vector.load %arg1[%c1_30, %c0_31, %c0_32] : memref<8x2x128xf32, #tpu.memory_space<vmem>>, vector<1x2x128xf32>
    %81 = vector.shape_cast %80 : vector<1x2x128xf32> to vector<2x128xf32>
    %82 = vector.extract_strided_slice %81 {offsets = [0, 0], sizes = [2, 64], strides = [1, 1]} : vector<2x128xf32> to vector<2x64xf32>
    %83 = arith.truncf %45 : vector<2x16xf32> to vector<2x16xbf16>
    %cst_33 = arith.constant dense<0.000000e+00> : vector<2x64xf32>
    %84 = tpu.matmul %83, %4, %cst_33 {dimension_numbers = #tpu.dot_dimension_numbers<[1], [0], [0], [1], [0, 0, 1, 1], [], []>} : vector<2x16xbf16>, vector<16x64xbf16>, vector<2x64xf32> -> vector<2x64xf32>
    %85 = arith.addf %82, %84 : vector<2x64xf32>
    %86 = vector.extract_strided_slice %85 {offsets = [0, 0], sizes = [2, 16], strides = [1, 1]} : vector<2x64xf32> to vector<2x16xf32>
    %87 = arith.negf %86 : vector<2x16xf32>
    %88 = math.exp %87 : vector<2x16xf32>
    %cst_34 = arith.constant 1.000000e+00 : f32
    %89 = vector.broadcast %cst_34 : f32 to vector<2x16xf32>
    %90 = arith.addf %89, %88 : vector<2x16xf32>
    %91 = arith.divf %89, %90 : vector<2x16xf32>
    %92 = vector.extract_strided_slice %85 {offsets = [0, 16], sizes = [2, 16], strides = [1, 1]} : vector<2x64xf32> to vector<2x16xf32>
    %93 = arith.negf %92 : vector<2x16xf32>
    %94 = math.exp %93 : vector<2x16xf32>
    %cst_35 = arith.constant 1.000000e+00 : f32
    %95 = vector.broadcast %cst_35 : f32 to vector<2x16xf32>
    %96 = arith.addf %95, %94 : vector<2x16xf32>
    %97 = arith.divf %95, %96 : vector<2x16xf32>
    %98 = vector.extract_strided_slice %85 {offsets = [0, 32], sizes = [2, 16], strides = [1, 1]} : vector<2x64xf32> to vector<2x16xf32>
    %99 = math.tanh %98 : vector<2x16xf32>
    %100 = vector.extract_strided_slice %85 {offsets = [0, 48], sizes = [2, 16], strides = [1, 1]} : vector<2x64xf32> to vector<2x16xf32>
    %101 = arith.negf %100 : vector<2x16xf32>
    %102 = math.exp %101 : vector<2x16xf32>
    %cst_36 = arith.constant 1.000000e+00 : f32
    %103 = vector.broadcast %cst_36 : f32 to vector<2x16xf32>
    %104 = arith.addf %103, %102 : vector<2x16xf32>
    %105 = arith.divf %103, %104 : vector<2x16xf32>
    %106 = arith.mulf %97, %43 : vector<2x16xf32>
    %107 = arith.mulf %91, %99 : vector<2x16xf32>
    %108 = arith.addf %106, %107 : vector<2x16xf32>
    %109 = math.tanh %108 : vector<2x16xf32>
    %110 = arith.mulf %105, %109 : vector<2x16xf32>
    %c6 = arith.constant 6 : index
    %c0_37 = arith.constant 0 : index
    %c0_38 = arith.constant 0 : index
    %111 = vector.load %arg2[%c6, %c0_37, %c0_38] : memref<8x2x128xf32, #tpu.memory_space<vmem>>, vector<1x2x128xf32>
    %112 = vector.shape_cast %111 : vector<1x2x128xf32> to vector<2x128xf32>
    %113 = vector.extract_strided_slice %112 {offsets = [0, 64], sizes = [2, 64], strides = [1, 1]} : vector<2x128xf32> to vector<2x64xf32>
    %114 = arith.truncf %78 : vector<2x16xf32> to vector<2x16xbf16>
    %cst_39 = arith.constant dense<0.000000e+00> : vector<2x64xf32>
    %115 = tpu.matmul %114, %6, %cst_39 {dimension_numbers = #tpu.dot_dimension_numbers<[1], [0], [0], [1], [0, 0, 1, 1], [], []>} : vector<2x16xbf16>, vector<16x64xbf16>, vector<2x64xf32> -> vector<2x64xf32>
    %116 = arith.addf %113, %115 : vector<2x64xf32>
    %117 = vector.extract_strided_slice %116 {offsets = [0, 0], sizes = [2, 16], strides = [1, 1]} : vector<2x64xf32> to vector<2x16xf32>
    %118 = arith.negf %117 : vector<2x16xf32>
    %119 = math.exp %118 : vector<2x16xf32>
    %cst_40 = arith.constant 1.000000e+00 : f32
    %120 = vector.broadcast %cst_40 : f32 to vector<2x16xf32>
    %121 = arith.addf %120, %119 : vector<2x16xf32>
    %122 = arith.divf %120, %121 : vector<2x16xf32>
    %123 = vector.extract_strided_slice %116 {offsets = [0, 16], sizes = [2, 16], strides = [1, 1]} : vector<2x64xf32> to vector<2x16xf32>
    %124 = arith.negf %123 : vector<2x16xf32>
    %125 = math.exp %124 : vector<2x16xf32>
    %cst_41 = arith.constant 1.000000e+00 : f32
    %126 = vector.broadcast %cst_41 : f32 to vector<2x16xf32>
    %127 = arith.addf %126, %125 : vector<2x16xf32>
    %128 = arith.divf %126, %127 : vector<2x16xf32>
    %129 = vector.extract_strided_slice %116 {offsets = [0, 32], sizes = [2, 16], strides = [1, 1]} : vector<2x64xf32> to vector<2x16xf32>
    %130 = math.tanh %129 : vector<2x16xf32>
    %131 = vector.extract_strided_slice %116 {offsets = [0, 48], sizes = [2, 16], strides = [1, 1]} : vector<2x64xf32> to vector<2x16xf32>
    %132 = arith.negf %131 : vector<2x16xf32>
    %133 = math.exp %132 : vector<2x16xf32>
    %cst_42 = arith.constant 1.000000e+00 : f32
    %134 = vector.broadcast %cst_42 : f32 to vector<2x16xf32>
    %135 = arith.addf %134, %133 : vector<2x16xf32>
    %136 = arith.divf %134, %135 : vector<2x16xf32>
    %137 = arith.mulf %128, %79 : vector<2x16xf32>
    %138 = arith.mulf %122, %130 : vector<2x16xf32>
    %139 = arith.addf %137, %138 : vector<2x16xf32>
    %140 = math.tanh %139 : vector<2x16xf32>
    %141 = arith.mulf %136, %140 : vector<2x16xf32>
    %c0_i32_43 = arith.constant 0 : i32
    %142 = arith.cmpi sgt, %arg0, %c0_i32_43 : i32
    %143 = arith.select %142, %141, %78 : vector<2x16xf32>
    %144 = arith.select %142, %139, %79 : vector<2x16xf32>
    %c2 = arith.constant 2 : index
    %c0_44 = arith.constant 0 : index
    %c0_45 = arith.constant 0 : index
    %145 = vector.load %arg1[%c2, %c0_44, %c0_45] : memref<8x2x128xf32, #tpu.memory_space<vmem>>, vector<1x2x128xf32>
    %146 = vector.shape_cast %145 : vector<1x2x128xf32> to vector<2x128xf32>
    %147 = vector.extract_strided_slice %146 {offsets = [0, 0], sizes = [2, 64], strides = [1, 1]} : vector<2x128xf32> to vector<2x64xf32>
    %148 = arith.truncf %110 : vector<2x16xf32> to vector<2x16xbf16>
    %cst_46 = arith.constant dense<0.000000e+00> : vector<2x64xf32>
    %149 = tpu.matmul %148, %4, %cst_46 {dimension_numbers = #tpu.dot_dimension_numbers<[1], [0], [0], [1], [0, 0, 1, 1], [], []>} : vector<2x16xbf16>, vector<16x64xbf16>, vector<2x64xf32> -> vector<2x64xf32>
    %150 = arith.addf %147, %149 : vector<2x64xf32>
    %151 = vector.extract_strided_slice %150 {offsets = [0, 0], sizes = [2, 16], strides = [1, 1]} : vector<2x64xf32> to vector<2x16xf32>
    %152 = arith.negf %151 : vector<2x16xf32>
    %153 = math.exp %152 : vector<2x16xf32>
    %cst_47 = arith.constant 1.000000e+00 : f32
    %154 = vector.broadcast %cst_47 : f32 to vector<2x16xf32>
    %155 = arith.addf %154, %153 : vector<2x16xf32>
    %156 = arith.divf %154, %155 : vector<2x16xf32>
    %157 = vector.extract_strided_slice %150 {offsets = [0, 16], sizes = [2, 16], strides = [1, 1]} : vector<2x64xf32> to vector<2x16xf32>
    %158 = arith.negf %157 : vector<2x16xf32>
    %159 = math.exp %158 : vector<2x16xf32>
    %cst_48 = arith.constant 1.000000e+00 : f32
    %160 = vector.broadcast %cst_48 : f32 to vector<2x16xf32>
    %161 = arith.addf %160, %159 : vector<2x16xf32>
    %162 = arith.divf %160, %161 : vector<2x16xf32>
    %163 = vector.extract_strided_slice %150 {offsets = [0, 32], sizes = [2, 16], strides = [1, 1]} : vector<2x64xf32> to vector<2x16xf32>
    %164 = math.tanh %163 : vector<2x16xf32>
    %165 = vector.extract_strided_slice %150 {offsets = [0, 48], sizes = [2, 16], strides = [1, 1]} : vector<2x64xf32> to vector<2x16xf32>
    %166 = arith.negf %165 : vector<2x16xf32>
    %167 = math.exp %166 : vector<2x16xf32>
    %cst_49 = arith.constant 1.000000e+00 : f32
    %168 = vector.broadcast %cst_49 : f32 to vector<2x16xf32>
    %169 = arith.addf %168, %167 : vector<2x16xf32>
    %170 = arith.divf %168, %169 : vector<2x16xf32>
    %171 = arith.mulf %162, %108 : vector<2x16xf32>
    %172 = arith.mulf %156, %164 : vector<2x16xf32>
    %173 = arith.addf %171, %172 : vector<2x16xf32>
    %174 = math.tanh %173 : vector<2x16xf32>
    %175 = arith.mulf %170, %174 : vector<2x16xf32>
    %c5 = arith.constant 5 : index
    %c0_50 = arith.constant 0 : index
    %c0_51 = arith.constant 0 : index
    %176 = vector.load %arg2[%c5, %c0_50, %c0_51] : memref<8x2x128xf32, #tpu.memory_space<vmem>>, vector<1x2x128xf32>
    %177 = vector.shape_cast %176 : vector<1x2x128xf32> to vector<2x128xf32>
    %178 = vector.extract_strided_slice %177 {offsets = [0, 64], sizes = [2, 64], strides = [1, 1]} : vector<2x128xf32> to vector<2x64xf32>
    %179 = arith.truncf %143 : vector<2x16xf32> to vector<2x16xbf16>
    %cst_52 = arith.constant dense<0.000000e+00> : vector<2x64xf32>
    %180 = tpu.matmul %179, %6, %cst_52 {dimension_numbers = #tpu.dot_dimension_numbers<[1], [0], [0], [1], [0, 0, 1, 1], [], []>} : vector<2x16xbf16>, vector<16x64xbf16>, vector<2x64xf32> -> vector<2x64xf32>
    %181 = arith.addf %178, %180 : vector<2x64xf32>
    %182 = vector.extract_strided_slice %181 {offsets = [0, 0], sizes = [2, 16], strides = [1, 1]} : vector<2x64xf32> to vector<2x16xf32>
    %183 = arith.negf %182 : vector<2x16xf32>
    %184 = math.exp %183 : vector<2x16xf32>
    %cst_53 = arith.constant 1.000000e+00 : f32
    %185 = vector.broadcast %cst_53 : f32 to vector<2x16xf32>
    %186 = arith.addf %185, %184 : vector<2x16xf32>
    %187 = arith.divf %185, %186 : vector<2x16xf32>
    %188 = vector.extract_strided_slice %181 {offsets = [0, 16], sizes = [2, 16], strides = [1, 1]} : vector<2x64xf32> to vector<2x16xf32>
    %189 = arith.negf %188 : vector<2x16xf32>
    %190 = math.exp %189 : vector<2x16xf32>
    %cst_54 = arith.constant 1.000000e+00 : f32
    %191 = vector.broadcast %cst_54 : f32 to vector<2x16xf32>
    %192 = arith.addf %191, %190 : vector<2x16xf32>
    %193 = arith.divf %191, %192 : vector<2x16xf32>
    %194 = vector.extract_strided_slice %181 {offsets = [0, 32], sizes = [2, 16], strides = [1, 1]} : vector<2x64xf32> to vector<2x16xf32>
    %195 = math.tanh %194 : vector<2x16xf32>
    %196 = vector.extract_strided_slice %181 {offsets = [0, 48], sizes = [2, 16], strides = [1, 1]} : vector<2x64xf32> to vector<2x16xf32>
    %197 = arith.negf %196 : vector<2x16xf32>
    %198 = math.exp %197 : vector<2x16xf32>
    %cst_55 = arith.constant 1.000000e+00 : f32
    %199 = vector.broadcast %cst_55 : f32 to vector<2x16xf32>
    %200 = arith.addf %199, %198 : vector<2x16xf32>
    %201 = arith.divf %199, %200 : vector<2x16xf32>
    %202 = arith.mulf %193, %144 : vector<2x16xf32>
    %203 = arith.mulf %187, %195 : vector<2x16xf32>
    %204 = arith.addf %202, %203 : vector<2x16xf32>
    %205 = math.tanh %204 : vector<2x16xf32>
    %206 = arith.mulf %201, %205 : vector<2x16xf32>
    %c0_i32_56 = arith.constant 0 : i32
    %207 = arith.cmpi sgt, %arg0, %c0_i32_56 : i32
    %208 = arith.select %207, %206, %143 : vector<2x16xf32>
    %209 = arith.select %207, %204, %144 : vector<2x16xf32>
    %c3 = arith.constant 3 : index
    %c0_57 = arith.constant 0 : index
    %c0_58 = arith.constant 0 : index
    %210 = vector.load %arg1[%c3, %c0_57, %c0_58] : memref<8x2x128xf32, #tpu.memory_space<vmem>>, vector<1x2x128xf32>
    %211 = vector.shape_cast %210 : vector<1x2x128xf32> to vector<2x128xf32>
    %212 = vector.extract_strided_slice %211 {offsets = [0, 0], sizes = [2, 64], strides = [1, 1]} : vector<2x128xf32> to vector<2x64xf32>
    %213 = arith.truncf %175 : vector<2x16xf32> to vector<2x16xbf16>
    %cst_59 = arith.constant dense<0.000000e+00> : vector<2x64xf32>
    %214 = tpu.matmul %213, %4, %cst_59 {dimension_numbers = #tpu.dot_dimension_numbers<[1], [0], [0], [1], [0, 0, 1, 1], [], []>} : vector<2x16xbf16>, vector<16x64xbf16>, vector<2x64xf32> -> vector<2x64xf32>
    %215 = arith.addf %212, %214 : vector<2x64xf32>
    %216 = vector.extract_strided_slice %215 {offsets = [0, 0], sizes = [2, 16], strides = [1, 1]} : vector<2x64xf32> to vector<2x16xf32>
    %217 = arith.negf %216 : vector<2x16xf32>
    %218 = math.exp %217 : vector<2x16xf32>
    %cst_60 = arith.constant 1.000000e+00 : f32
    %219 = vector.broadcast %cst_60 : f32 to vector<2x16xf32>
    %220 = arith.addf %219, %218 : vector<2x16xf32>
    %221 = arith.divf %219, %220 : vector<2x16xf32>
    %222 = vector.extract_strided_slice %215 {offsets = [0, 16], sizes = [2, 16], strides = [1, 1]} : vector<2x64xf32> to vector<2x16xf32>
    %223 = arith.negf %222 : vector<2x16xf32>
    %224 = math.exp %223 : vector<2x16xf32>
    %cst_61 = arith.constant 1.000000e+00 : f32
    %225 = vector.broadcast %cst_61 : f32 to vector<2x16xf32>
    %226 = arith.addf %225, %224 : vector<2x16xf32>
    %227 = arith.divf %225, %226 : vector<2x16xf32>
    %228 = vector.extract_strided_slice %215 {offsets = [0, 32], sizes = [2, 16], strides = [1, 1]} : vector<2x64xf32> to vector<2x16xf32>
    %229 = math.tanh %228 : vector<2x16xf32>
    %230 = vector.extract_strided_slice %215 {offsets = [0, 48], sizes = [2, 16], strides = [1, 1]} : vector<2x64xf32> to vector<2x16xf32>
    %231 = arith.negf %230 : vector<2x16xf32>
    %232 = math.exp %231 : vector<2x16xf32>
    %cst_62 = arith.constant 1.000000e+00 : f32
    %233 = vector.broadcast %cst_62 : f32 to vector<2x16xf32>
    %234 = arith.addf %233, %232 : vector<2x16xf32>
    %235 = arith.divf %233, %234 : vector<2x16xf32>
    %236 = arith.mulf %227, %173 : vector<2x16xf32>
    %237 = arith.mulf %221, %229 : vector<2x16xf32>
    %238 = arith.addf %236, %237 : vector<2x16xf32>
    %239 = math.tanh %238 : vector<2x16xf32>
    %240 = arith.mulf %235, %239 : vector<2x16xf32>
    %c4 = arith.constant 4 : index
    %c0_63 = arith.constant 0 : index
    %c0_64 = arith.constant 0 : index
    %241 = vector.load %arg2[%c4, %c0_63, %c0_64] : memref<8x2x128xf32, #tpu.memory_space<vmem>>, vector<1x2x128xf32>
    %242 = vector.shape_cast %241 : vector<1x2x128xf32> to vector<2x128xf32>
    %243 = vector.extract_strided_slice %242 {offsets = [0, 64], sizes = [2, 64], strides = [1, 1]} : vector<2x128xf32> to vector<2x64xf32>
    %244 = arith.truncf %208 : vector<2x16xf32> to vector<2x16xbf16>
    %cst_65 = arith.constant dense<0.000000e+00> : vector<2x64xf32>
    %245 = tpu.matmul %244, %6, %cst_65 {dimension_numbers = #tpu.dot_dimension_numbers<[1], [0], [0], [1], [0, 0, 1, 1], [], []>} : vector<2x16xbf16>, vector<16x64xbf16>, vector<2x64xf32> -> vector<2x64xf32>
    %246 = arith.addf %243, %245 : vector<2x64xf32>
    %247 = vector.extract_strided_slice %246 {offsets = [0, 0], sizes = [2, 16], strides = [1, 1]} : vector<2x64xf32> to vector<2x16xf32>
    %248 = arith.negf %247 : vector<2x16xf32>
    %249 = math.exp %248 : vector<2x16xf32>
    %cst_66 = arith.constant 1.000000e+00 : f32
    %250 = vector.broadcast %cst_66 : f32 to vector<2x16xf32>
    %251 = arith.addf %250, %249 : vector<2x16xf32>
    %252 = arith.divf %250, %251 : vector<2x16xf32>
    %253 = vector.extract_strided_slice %246 {offsets = [0, 16], sizes = [2, 16], strides = [1, 1]} : vector<2x64xf32> to vector<2x16xf32>
    %254 = arith.negf %253 : vector<2x16xf32>
    %255 = math.exp %254 : vector<2x16xf32>
    %cst_67 = arith.constant 1.000000e+00 : f32
    %256 = vector.broadcast %cst_67 : f32 to vector<2x16xf32>
    %257 = arith.addf %256, %255 : vector<2x16xf32>
    %258 = arith.divf %256, %257 : vector<2x16xf32>
    %259 = vector.extract_strided_slice %246 {offsets = [0, 32], sizes = [2, 16], strides = [1, 1]} : vector<2x64xf32> to vector<2x16xf32>
    %260 = math.tanh %259 : vector<2x16xf32>
    %261 = vector.extract_strided_slice %246 {offsets = [0, 48], sizes = [2, 16], strides = [1, 1]} : vector<2x64xf32> to vector<2x16xf32>
    %262 = arith.negf %261 : vector<2x16xf32>
    %263 = math.exp %262 : vector<2x16xf32>
    %cst_68 = arith.constant 1.000000e+00 : f32
    %264 = vector.broadcast %cst_68 : f32 to vector<2x16xf32>
    %265 = arith.addf %264, %263 : vector<2x16xf32>
    %266 = arith.divf %264, %265 : vector<2x16xf32>
    %267 = arith.mulf %258, %209 : vector<2x16xf32>
    %268 = arith.mulf %252, %260 : vector<2x16xf32>
    %269 = arith.addf %267, %268 : vector<2x16xf32>
    %270 = math.tanh %269 : vector<2x16xf32>
    %271 = arith.mulf %266, %270 : vector<2x16xf32>
    %c0_i32_69 = arith.constant 0 : i32
    %272 = arith.cmpi sgt, %arg0, %c0_i32_69 : i32
    %273 = arith.select %272, %271, %208 : vector<2x16xf32>
    %274 = arith.select %272, %269, %209 : vector<2x16xf32>
    %c4_70 = arith.constant 4 : index
    %c0_71 = arith.constant 0 : index
    %c0_72 = arith.constant 0 : index
    %275 = vector.load %arg1[%c4_70, %c0_71, %c0_72] : memref<8x2x128xf32, #tpu.memory_space<vmem>>, vector<1x2x128xf32>
    %276 = vector.shape_cast %275 : vector<1x2x128xf32> to vector<2x128xf32>
    %277 = vector.extract_strided_slice %276 {offsets = [0, 0], sizes = [2, 64], strides = [1, 1]} : vector<2x128xf32> to vector<2x64xf32>
    %278 = arith.truncf %240 : vector<2x16xf32> to vector<2x16xbf16>
    %cst_73 = arith.constant dense<0.000000e+00> : vector<2x64xf32>
    %279 = tpu.matmul %278, %4, %cst_73 {dimension_numbers = #tpu.dot_dimension_numbers<[1], [0], [0], [1], [0, 0, 1, 1], [], []>} : vector<2x16xbf16>, vector<16x64xbf16>, vector<2x64xf32> -> vector<2x64xf32>
    %280 = arith.addf %277, %279 : vector<2x64xf32>
    %281 = vector.extract_strided_slice %280 {offsets = [0, 0], sizes = [2, 16], strides = [1, 1]} : vector<2x64xf32> to vector<2x16xf32>
    %282 = arith.negf %281 : vector<2x16xf32>
    %283 = math.exp %282 : vector<2x16xf32>
    %cst_74 = arith.constant 1.000000e+00 : f32
    %284 = vector.broadcast %cst_74 : f32 to vector<2x16xf32>
    %285 = arith.addf %284, %283 : vector<2x16xf32>
    %286 = arith.divf %284, %285 : vector<2x16xf32>
    %287 = vector.extract_strided_slice %280 {offsets = [0, 16], sizes = [2, 16], strides = [1, 1]} : vector<2x64xf32> to vector<2x16xf32>
    %288 = arith.negf %287 : vector<2x16xf32>
    %289 = math.exp %288 : vector<2x16xf32>
    %cst_75 = arith.constant 1.000000e+00 : f32
    %290 = vector.broadcast %cst_75 : f32 to vector<2x16xf32>
    %291 = arith.addf %290, %289 : vector<2x16xf32>
    %292 = arith.divf %290, %291 : vector<2x16xf32>
    %293 = vector.extract_strided_slice %280 {offsets = [0, 32], sizes = [2, 16], strides = [1, 1]} : vector<2x64xf32> to vector<2x16xf32>
    %294 = math.tanh %293 : vector<2x16xf32>
    %295 = vector.extract_strided_slice %280 {offsets = [0, 48], sizes = [2, 16], strides = [1, 1]} : vector<2x64xf32> to vector<2x16xf32>
    %296 = arith.negf %295 : vector<2x16xf32>
    %297 = math.exp %296 : vector<2x16xf32>
    %cst_76 = arith.constant 1.000000e+00 : f32
    %298 = vector.broadcast %cst_76 : f32 to vector<2x16xf32>
    %299 = arith.addf %298, %297 : vector<2x16xf32>
    %300 = arith.divf %298, %299 : vector<2x16xf32>
    %301 = arith.mulf %292, %238 : vector<2x16xf32>
    %302 = arith.mulf %286, %294 : vector<2x16xf32>
    %303 = arith.addf %301, %302 : vector<2x16xf32>
    %304 = math.tanh %303 : vector<2x16xf32>
    %305 = arith.mulf %300, %304 : vector<2x16xf32>
    %c3_77 = arith.constant 3 : index
    %c0_78 = arith.constant 0 : index
    %c0_79 = arith.constant 0 : index
    %306 = vector.load %arg2[%c3_77, %c0_78, %c0_79] : memref<8x2x128xf32, #tpu.memory_space<vmem>>, vector<1x2x128xf32>
    %307 = vector.shape_cast %306 : vector<1x2x128xf32> to vector<2x128xf32>
    %308 = vector.extract_strided_slice %307 {offsets = [0, 64], sizes = [2, 64], strides = [1, 1]} : vector<2x128xf32> to vector<2x64xf32>
    %309 = arith.truncf %273 : vector<2x16xf32> to vector<2x16xbf16>
    %cst_80 = arith.constant dense<0.000000e+00> : vector<2x64xf32>
    %310 = tpu.matmul %309, %6, %cst_80 {dimension_numbers = #tpu.dot_dimension_numbers<[1], [0], [0], [1], [0, 0, 1, 1], [], []>} : vector<2x16xbf16>, vector<16x64xbf16>, vector<2x64xf32> -> vector<2x64xf32>
    %311 = arith.addf %308, %310 : vector<2x64xf32>
    %312 = vector.extract_strided_slice %311 {offsets = [0, 0], sizes = [2, 16], strides = [1, 1]} : vector<2x64xf32> to vector<2x16xf32>
    %313 = arith.negf %312 : vector<2x16xf32>
    %314 = math.exp %313 : vector<2x16xf32>
    %cst_81 = arith.constant 1.000000e+00 : f32
    %315 = vector.broadcast %cst_81 : f32 to vector<2x16xf32>
    %316 = arith.addf %315, %314 : vector<2x16xf32>
    %317 = arith.divf %315, %316 : vector<2x16xf32>
    %318 = vector.extract_strided_slice %311 {offsets = [0, 16], sizes = [2, 16], strides = [1, 1]} : vector<2x64xf32> to vector<2x16xf32>
    %319 = arith.negf %318 : vector<2x16xf32>
    %320 = math.exp %319 : vector<2x16xf32>
    %cst_82 = arith.constant 1.000000e+00 : f32
    %321 = vector.broadcast %cst_82 : f32 to vector<2x16xf32>
    %322 = arith.addf %321, %320 : vector<2x16xf32>
    %323 = arith.divf %321, %322 : vector<2x16xf32>
    %324 = vector.extract_strided_slice %311 {offsets = [0, 32], sizes = [2, 16], strides = [1, 1]} : vector<2x64xf32> to vector<2x16xf32>
    %325 = math.tanh %324 : vector<2x16xf32>
    %326 = vector.extract_strided_slice %311 {offsets = [0, 48], sizes = [2, 16], strides = [1, 1]} : vector<2x64xf32> to vector<2x16xf32>
    %327 = arith.negf %326 : vector<2x16xf32>
    %328 = math.exp %327 : vector<2x16xf32>
    %cst_83 = arith.constant 1.000000e+00 : f32
    %329 = vector.broadcast %cst_83 : f32 to vector<2x16xf32>
    %330 = arith.addf %329, %328 : vector<2x16xf32>
    %331 = arith.divf %329, %330 : vector<2x16xf32>
    %332 = arith.mulf %323, %274 : vector<2x16xf32>
    %333 = arith.mulf %317, %325 : vector<2x16xf32>
    %334 = arith.addf %332, %333 : vector<2x16xf32>
    %335 = math.tanh %334 : vector<2x16xf32>
    %336 = arith.mulf %331, %335 : vector<2x16xf32>
    %c0_i32_84 = arith.constant 0 : i32
    %337 = arith.cmpi sgt, %arg0, %c0_i32_84 : i32
    %338 = arith.select %337, %336, %273 : vector<2x16xf32>
    %339 = arith.select %337, %334, %274 : vector<2x16xf32>
    %c5_85 = arith.constant 5 : index
    %c0_86 = arith.constant 0 : index
    %c0_87 = arith.constant 0 : index
    %340 = vector.load %arg1[%c5_85, %c0_86, %c0_87] : memref<8x2x128xf32, #tpu.memory_space<vmem>>, vector<1x2x128xf32>
    %341 = vector.shape_cast %340 : vector<1x2x128xf32> to vector<2x128xf32>
    %342 = vector.extract_strided_slice %341 {offsets = [0, 0], sizes = [2, 64], strides = [1, 1]} : vector<2x128xf32> to vector<2x64xf32>
    %343 = arith.truncf %305 : vector<2x16xf32> to vector<2x16xbf16>
    %cst_88 = arith.constant dense<0.000000e+00> : vector<2x64xf32>
    %344 = tpu.matmul %343, %4, %cst_88 {dimension_numbers = #tpu.dot_dimension_numbers<[1], [0], [0], [1], [0, 0, 1, 1], [], []>} : vector<2x16xbf16>, vector<16x64xbf16>, vector<2x64xf32> -> vector<2x64xf32>
    %345 = arith.addf %342, %344 : vector<2x64xf32>
    %346 = vector.extract_strided_slice %345 {offsets = [0, 0], sizes = [2, 16], strides = [1, 1]} : vector<2x64xf32> to vector<2x16xf32>
    %347 = arith.negf %346 : vector<2x16xf32>
    %348 = math.exp %347 : vector<2x16xf32>
    %cst_89 = arith.constant 1.000000e+00 : f32
    %349 = vector.broadcast %cst_89 : f32 to vector<2x16xf32>
    %350 = arith.addf %349, %348 : vector<2x16xf32>
    %351 = arith.divf %349, %350 : vector<2x16xf32>
    %352 = vector.extract_strided_slice %345 {offsets = [0, 16], sizes = [2, 16], strides = [1, 1]} : vector<2x64xf32> to vector<2x16xf32>
    %353 = arith.negf %352 : vector<2x16xf32>
    %354 = math.exp %353 : vector<2x16xf32>
    %cst_90 = arith.constant 1.000000e+00 : f32
    %355 = vector.broadcast %cst_90 : f32 to vector<2x16xf32>
    %356 = arith.addf %355, %354 : vector<2x16xf32>
    %357 = arith.divf %355, %356 : vector<2x16xf32>
    %358 = vector.extract_strided_slice %345 {offsets = [0, 32], sizes = [2, 16], strides = [1, 1]} : vector<2x64xf32> to vector<2x16xf32>
    %359 = math.tanh %358 : vector<2x16xf32>
    %360 = vector.extract_strided_slice %345 {offsets = [0, 48], sizes = [2, 16], strides = [1, 1]} : vector<2x64xf32> to vector<2x16xf32>
    %361 = arith.negf %360 : vector<2x16xf32>
    %362 = math.exp %361 : vector<2x16xf32>
    %cst_91 = arith.constant 1.000000e+00 : f32
    %363 = vector.broadcast %cst_91 : f32 to vector<2x16xf32>
    %364 = arith.addf %363, %362 : vector<2x16xf32>
    %365 = arith.divf %363, %364 : vector<2x16xf32>
    %366 = arith.mulf %357, %303 : vector<2x16xf32>
    %367 = arith.mulf %351, %359 : vector<2x16xf32>
    %368 = arith.addf %366, %367 : vector<2x16xf32>
    %369 = math.tanh %368 : vector<2x16xf32>
    %370 = arith.mulf %365, %369 : vector<2x16xf32>
    %c2_92 = arith.constant 2 : index
    %c0_93 = arith.constant 0 : index
    %c0_94 = arith.constant 0 : index
    %371 = vector.load %arg2[%c2_92, %c0_93, %c0_94] : memref<8x2x128xf32, #tpu.memory_space<vmem>>, vector<1x2x128xf32>
    %372 = vector.shape_cast %371 : vector<1x2x128xf32> to vector<2x128xf32>
    %373 = vector.extract_strided_slice %372 {offsets = [0, 64], sizes = [2, 64], strides = [1, 1]} : vector<2x128xf32> to vector<2x64xf32>
    %374 = arith.truncf %338 : vector<2x16xf32> to vector<2x16xbf16>
    %cst_95 = arith.constant dense<0.000000e+00> : vector<2x64xf32>
    %375 = tpu.matmul %374, %6, %cst_95 {dimension_numbers = #tpu.dot_dimension_numbers<[1], [0], [0], [1], [0, 0, 1, 1], [], []>} : vector<2x16xbf16>, vector<16x64xbf16>, vector<2x64xf32> -> vector<2x64xf32>
    %376 = arith.addf %373, %375 : vector<2x64xf32>
    %377 = vector.extract_strided_slice %376 {offsets = [0, 0], sizes = [2, 16], strides = [1, 1]} : vector<2x64xf32> to vector<2x16xf32>
    %378 = arith.negf %377 : vector<2x16xf32>
    %379 = math.exp %378 : vector<2x16xf32>
    %cst_96 = arith.constant 1.000000e+00 : f32
    %380 = vector.broadcast %cst_96 : f32 to vector<2x16xf32>
    %381 = arith.addf %380, %379 : vector<2x16xf32>
    %382 = arith.divf %380, %381 : vector<2x16xf32>
    %383 = vector.extract_strided_slice %376 {offsets = [0, 16], sizes = [2, 16], strides = [1, 1]} : vector<2x64xf32> to vector<2x16xf32>
    %384 = arith.negf %383 : vector<2x16xf32>
    %385 = math.exp %384 : vector<2x16xf32>
    %cst_97 = arith.constant 1.000000e+00 : f32
    %386 = vector.broadcast %cst_97 : f32 to vector<2x16xf32>
    %387 = arith.addf %386, %385 : vector<2x16xf32>
    %388 = arith.divf %386, %387 : vector<2x16xf32>
    %389 = vector.extract_strided_slice %376 {offsets = [0, 32], sizes = [2, 16], strides = [1, 1]} : vector<2x64xf32> to vector<2x16xf32>
    %390 = math.tanh %389 : vector<2x16xf32>
    %391 = vector.extract_strided_slice %376 {offsets = [0, 48], sizes = [2, 16], strides = [1, 1]} : vector<2x64xf32> to vector<2x16xf32>
    %392 = arith.negf %391 : vector<2x16xf32>
    %393 = math.exp %392 : vector<2x16xf32>
    %cst_98 = arith.constant 1.000000e+00 : f32
    %394 = vector.broadcast %cst_98 : f32 to vector<2x16xf32>
    %395 = arith.addf %394, %393 : vector<2x16xf32>
    %396 = arith.divf %394, %395 : vector<2x16xf32>
    %397 = arith.mulf %388, %339 : vector<2x16xf32>
    %398 = arith.mulf %382, %390 : vector<2x16xf32>
    %399 = arith.addf %397, %398 : vector<2x16xf32>
    %400 = math.tanh %399 : vector<2x16xf32>
    %401 = arith.mulf %396, %400 : vector<2x16xf32>
    %c0_i32_99 = arith.constant 0 : i32
    %402 = arith.cmpi sgt, %arg0, %c0_i32_99 : i32
    %403 = arith.select %402, %401, %338 : vector<2x16xf32>
    %404 = arith.select %402, %399, %339 : vector<2x16xf32>
    %c6_100 = arith.constant 6 : index
    %c0_101 = arith.constant 0 : index
    %c0_102 = arith.constant 0 : index
    %405 = vector.load %arg1[%c6_100, %c0_101, %c0_102] : memref<8x2x128xf32, #tpu.memory_space<vmem>>, vector<1x2x128xf32>
    %406 = vector.shape_cast %405 : vector<1x2x128xf32> to vector<2x128xf32>
    %407 = vector.extract_strided_slice %406 {offsets = [0, 0], sizes = [2, 64], strides = [1, 1]} : vector<2x128xf32> to vector<2x64xf32>
    %408 = arith.truncf %370 : vector<2x16xf32> to vector<2x16xbf16>
    %cst_103 = arith.constant dense<0.000000e+00> : vector<2x64xf32>
    %409 = tpu.matmul %408, %4, %cst_103 {dimension_numbers = #tpu.dot_dimension_numbers<[1], [0], [0], [1], [0, 0, 1, 1], [], []>} : vector<2x16xbf16>, vector<16x64xbf16>, vector<2x64xf32> -> vector<2x64xf32>
    %410 = arith.addf %407, %409 : vector<2x64xf32>
    %411 = vector.extract_strided_slice %410 {offsets = [0, 0], sizes = [2, 16], strides = [1, 1]} : vector<2x64xf32> to vector<2x16xf32>
    %412 = arith.negf %411 : vector<2x16xf32>
    %413 = math.exp %412 : vector<2x16xf32>
    %cst_104 = arith.constant 1.000000e+00 : f32
    %414 = vector.broadcast %cst_104 : f32 to vector<2x16xf32>
    %415 = arith.addf %414, %413 : vector<2x16xf32>
    %416 = arith.divf %414, %415 : vector<2x16xf32>
    %417 = vector.extract_strided_slice %410 {offsets = [0, 16], sizes = [2, 16], strides = [1, 1]} : vector<2x64xf32> to vector<2x16xf32>
    %418 = arith.negf %417 : vector<2x16xf32>
    %419 = math.exp %418 : vector<2x16xf32>
    %cst_105 = arith.constant 1.000000e+00 : f32
    %420 = vector.broadcast %cst_105 : f32 to vector<2x16xf32>
    %421 = arith.addf %420, %419 : vector<2x16xf32>
    %422 = arith.divf %420, %421 : vector<2x16xf32>
    %423 = vector.extract_strided_slice %410 {offsets = [0, 32], sizes = [2, 16], strides = [1, 1]} : vector<2x64xf32> to vector<2x16xf32>
    %424 = math.tanh %423 : vector<2x16xf32>
    %425 = vector.extract_strided_slice %410 {offsets = [0, 48], sizes = [2, 16], strides = [1, 1]} : vector<2x64xf32> to vector<2x16xf32>
    %426 = arith.negf %425 : vector<2x16xf32>
    %427 = math.exp %426 : vector<2x16xf32>
    %cst_106 = arith.constant 1.000000e+00 : f32
    %428 = vector.broadcast %cst_106 : f32 to vector<2x16xf32>
    %429 = arith.addf %428, %427 : vector<2x16xf32>
    %430 = arith.divf %428, %429 : vector<2x16xf32>
    %431 = arith.mulf %422, %368 : vector<2x16xf32>
    %432 = arith.mulf %416, %424 : vector<2x16xf32>
    %433 = arith.addf %431, %432 : vector<2x16xf32>
    %434 = math.tanh %433 : vector<2x16xf32>
    %435 = arith.mulf %430, %434 : vector<2x16xf32>
    %c1_107 = arith.constant 1 : index
    %c0_108 = arith.constant 0 : index
    %c0_109 = arith.constant 0 : index
    %436 = vector.load %arg2[%c1_107, %c0_108, %c0_109] : memref<8x2x128xf32, #tpu.memory_space<vmem>>, vector<1x2x128xf32>
    %437 = vector.shape_cast %436 : vector<1x2x128xf32> to vector<2x128xf32>
    %438 = vector.extract_strided_slice %437 {offsets = [0, 64], sizes = [2, 64], strides = [1, 1]} : vector<2x128xf32> to vector<2x64xf32>
    %439 = arith.truncf %403 : vector<2x16xf32> to vector<2x16xbf16>
    %cst_110 = arith.constant dense<0.000000e+00> : vector<2x64xf32>
    %440 = tpu.matmul %439, %6, %cst_110 {dimension_numbers = #tpu.dot_dimension_numbers<[1], [0], [0], [1], [0, 0, 1, 1], [], []>} : vector<2x16xbf16>, vector<16x64xbf16>, vector<2x64xf32> -> vector<2x64xf32>
    %441 = arith.addf %438, %440 : vector<2x64xf32>
    %442 = vector.extract_strided_slice %441 {offsets = [0, 0], sizes = [2, 16], strides = [1, 1]} : vector<2x64xf32> to vector<2x16xf32>
    %443 = arith.negf %442 : vector<2x16xf32>
    %444 = math.exp %443 : vector<2x16xf32>
    %cst_111 = arith.constant 1.000000e+00 : f32
    %445 = vector.broadcast %cst_111 : f32 to vector<2x16xf32>
    %446 = arith.addf %445, %444 : vector<2x16xf32>
    %447 = arith.divf %445, %446 : vector<2x16xf32>
    %448 = vector.extract_strided_slice %441 {offsets = [0, 16], sizes = [2, 16], strides = [1, 1]} : vector<2x64xf32> to vector<2x16xf32>
    %449 = arith.negf %448 : vector<2x16xf32>
    %450 = math.exp %449 : vector<2x16xf32>
    %cst_112 = arith.constant 1.000000e+00 : f32
    %451 = vector.broadcast %cst_112 : f32 to vector<2x16xf32>
    %452 = arith.addf %451, %450 : vector<2x16xf32>
    %453 = arith.divf %451, %452 : vector<2x16xf32>
    %454 = vector.extract_strided_slice %441 {offsets = [0, 32], sizes = [2, 16], strides = [1, 1]} : vector<2x64xf32> to vector<2x16xf32>
    %455 = math.tanh %454 : vector<2x16xf32>
    %456 = vector.extract_strided_slice %441 {offsets = [0, 48], sizes = [2, 16], strides = [1, 1]} : vector<2x64xf32> to vector<2x16xf32>
    %457 = arith.negf %456 : vector<2x16xf32>
    %458 = math.exp %457 : vector<2x16xf32>
    %cst_113 = arith.constant 1.000000e+00 : f32
    %459 = vector.broadcast %cst_113 : f32 to vector<2x16xf32>
    %460 = arith.addf %459, %458 : vector<2x16xf32>
    %461 = arith.divf %459, %460 : vector<2x16xf32>
    %462 = arith.mulf %453, %404 : vector<2x16xf32>
    %463 = arith.mulf %447, %455 : vector<2x16xf32>
    %464 = arith.addf %462, %463 : vector<2x16xf32>
    %465 = math.tanh %464 : vector<2x16xf32>
    %466 = arith.mulf %461, %465 : vector<2x16xf32>
    %c0_i32_114 = arith.constant 0 : i32
    %467 = arith.cmpi sgt, %arg0, %c0_i32_114 : i32
    %468 = arith.select %467, %466, %403 : vector<2x16xf32>
    %469 = arith.select %467, %464, %404 : vector<2x16xf32>
    %c7_115 = arith.constant 7 : index
    %c0_116 = arith.constant 0 : index
    %c0_117 = arith.constant 0 : index
    %470 = vector.load %arg1[%c7_115, %c0_116, %c0_117] : memref<8x2x128xf32, #tpu.memory_space<vmem>>, vector<1x2x128xf32>
    %471 = vector.shape_cast %470 : vector<1x2x128xf32> to vector<2x128xf32>
    %472 = vector.extract_strided_slice %471 {offsets = [0, 0], sizes = [2, 64], strides = [1, 1]} : vector<2x128xf32> to vector<2x64xf32>
    %473 = arith.truncf %435 : vector<2x16xf32> to vector<2x16xbf16>
    %cst_118 = arith.constant dense<0.000000e+00> : vector<2x64xf32>
    %474 = tpu.matmul %473, %4, %cst_118 {dimension_numbers = #tpu.dot_dimension_numbers<[1], [0], [0], [1], [0, 0, 1, 1], [], []>} : vector<2x16xbf16>, vector<16x64xbf16>, vector<2x64xf32> -> vector<2x64xf32>
    %475 = arith.addf %472, %474 : vector<2x64xf32>
    %476 = vector.extract_strided_slice %475 {offsets = [0, 0], sizes = [2, 16], strides = [1, 1]} : vector<2x64xf32> to vector<2x16xf32>
    %477 = arith.negf %476 : vector<2x16xf32>
    %478 = math.exp %477 : vector<2x16xf32>
    %cst_119 = arith.constant 1.000000e+00 : f32
    %479 = vector.broadcast %cst_119 : f32 to vector<2x16xf32>
    %480 = arith.addf %479, %478 : vector<2x16xf32>
    %481 = arith.divf %479, %480 : vector<2x16xf32>
    %482 = vector.extract_strided_slice %475 {offsets = [0, 16], sizes = [2, 16], strides = [1, 1]} : vector<2x64xf32> to vector<2x16xf32>
    %483 = arith.negf %482 : vector<2x16xf32>
    %484 = math.exp %483 : vector<2x16xf32>
    %cst_120 = arith.constant 1.000000e+00 : f32
    %485 = vector.broadcast %cst_120 : f32 to vector<2x16xf32>
    %486 = arith.addf %485, %484 : vector<2x16xf32>
    %487 = arith.divf %485, %486 : vector<2x16xf32>
    %488 = vector.extract_strided_slice %475 {offsets = [0, 32], sizes = [2, 16], strides = [1, 1]} : vector<2x64xf32> to vector<2x16xf32>
    %489 = math.tanh %488 : vector<2x16xf32>
    %490 = vector.extract_strided_slice %475 {offsets = [0, 48], sizes = [2, 16], strides = [1, 1]} : vector<2x64xf32> to vector<2x16xf32>
    %491 = arith.negf %490 : vector<2x16xf32>
    %492 = math.exp %491 : vector<2x16xf32>
    %cst_121 = arith.constant 1.000000e+00 : f32
    %493 = vector.broadcast %cst_121 : f32 to vector<2x16xf32>
    %494 = arith.addf %493, %492 : vector<2x16xf32>
    %495 = arith.divf %493, %494 : vector<2x16xf32>
    %496 = arith.mulf %487, %433 : vector<2x16xf32>
    %497 = arith.mulf %481, %489 : vector<2x16xf32>
    %498 = arith.addf %496, %497 : vector<2x16xf32>
    %499 = math.tanh %498 : vector<2x16xf32>
    %500 = arith.mulf %495, %499 : vector<2x16xf32>
    %c0_122 = arith.constant 0 : index
    %c0_123 = arith.constant 0 : index
    %c0_124 = arith.constant 0 : index
    %501 = vector.load %arg2[%c0_122, %c0_123, %c0_124] : memref<8x2x128xf32, #tpu.memory_space<vmem>>, vector<1x2x128xf32>
    %502 = vector.shape_cast %501 : vector<1x2x128xf32> to vector<2x128xf32>
    %503 = vector.extract_strided_slice %502 {offsets = [0, 64], sizes = [2, 64], strides = [1, 1]} : vector<2x128xf32> to vector<2x64xf32>
    %504 = arith.truncf %468 : vector<2x16xf32> to vector<2x16xbf16>
    %cst_125 = arith.constant dense<0.000000e+00> : vector<2x64xf32>
    %505 = tpu.matmul %504, %6, %cst_125 {dimension_numbers = #tpu.dot_dimension_numbers<[1], [0], [0], [1], [0, 0, 1, 1], [], []>} : vector<2x16xbf16>, vector<16x64xbf16>, vector<2x64xf32> -> vector<2x64xf32>
    %506 = arith.addf %503, %505 : vector<2x64xf32>
    %507 = vector.extract_strided_slice %506 {offsets = [0, 0], sizes = [2, 16], strides = [1, 1]} : vector<2x64xf32> to vector<2x16xf32>
    %508 = arith.negf %507 : vector<2x16xf32>
    %509 = math.exp %508 : vector<2x16xf32>
    %cst_126 = arith.constant 1.000000e+00 : f32
    %510 = vector.broadcast %cst_126 : f32 to vector<2x16xf32>
    %511 = arith.addf %510, %509 : vector<2x16xf32>
    %512 = arith.divf %510, %511 : vector<2x16xf32>
    %513 = vector.extract_strided_slice %506 {offsets = [0, 16], sizes = [2, 16], strides = [1, 1]} : vector<2x64xf32> to vector<2x16xf32>
    %514 = arith.negf %513 : vector<2x16xf32>
    %515 = math.exp %514 : vector<2x16xf32>
    %cst_127 = arith.constant 1.000000e+00 : f32
    %516 = vector.broadcast %cst_127 : f32 to vector<2x16xf32>
    %517 = arith.addf %516, %515 : vector<2x16xf32>
    %518 = arith.divf %516, %517 : vector<2x16xf32>
    %519 = vector.extract_strided_slice %506 {offsets = [0, 32], sizes = [2, 16], strides = [1, 1]} : vector<2x64xf32> to vector<2x16xf32>
    %520 = math.tanh %519 : vector<2x16xf32>
    %521 = vector.extract_strided_slice %506 {offsets = [0, 48], sizes = [2, 16], strides = [1, 1]} : vector<2x64xf32> to vector<2x16xf32>
    %522 = arith.negf %521 : vector<2x16xf32>
    %523 = math.exp %522 : vector<2x16xf32>
    %cst_128 = arith.constant 1.000000e+00 : f32
    %524 = vector.broadcast %cst_128 : f32 to vector<2x16xf32>
    %525 = arith.addf %524, %523 : vector<2x16xf32>
    %526 = arith.divf %524, %525 : vector<2x16xf32>
    %527 = arith.mulf %518, %469 : vector<2x16xf32>
    %528 = arith.mulf %512, %520 : vector<2x16xf32>
    %529 = arith.addf %527, %528 : vector<2x16xf32>
    %530 = math.tanh %529 : vector<2x16xf32>
    %531 = arith.mulf %526, %530 : vector<2x16xf32>
    %532 = tpu.concatenate %45, %110, %175, %240, %305, %370, %435, %500 in 1 : vector<2x16xf32>, vector<2x16xf32>, vector<2x16xf32>, vector<2x16xf32>, vector<2x16xf32>, vector<2x16xf32>, vector<2x16xf32>, vector<2x16xf32> -> vector<2x128xf32>
    %c0_129 = arith.constant 0 : index
    %c0_130 = arith.constant 0 : index
    %c0_131 = arith.constant 0 : index
    %533 = vector.load %arg4[%c0_129, %c0_130, %c0_131] : memref<1x2x128xf32, #tpu.memory_space<vmem>>, vector<1x2x128xf32>
    %534 = vector.shape_cast %533 : vector<1x2x128xf32> to vector<2x128xf32>
    %535 = vector.shape_cast %532 : vector<2x128xf32> to vector<1x2x128xf32>
    tpu.vector_store %arg4[%c0_129, %c0_130, %c0_131], %535 {strides = array<i32>} : memref<1x2x128xf32, #tpu.memory_space<vmem>>, vector<1x2x128xf32>,
    %536 = tpu.concatenate %531, %468, %403, %338, %273, %208, %143, %78 in 1 : vector<2x16xf32>, vector<2x16xf32>, vector<2x16xf32>, vector<2x16xf32>, vector<2x16xf32>, vector<2x16xf32>, vector<2x16xf32>, vector<2x16xf32> -> vector<2x128xf32>
    %c0_132 = arith.constant 0 : index
    %c0_133 = arith.constant 0 : index
    %c0_134 = arith.constant 0 : index
    %537 = vector.load %arg5[%c0_132, %c0_133, %c0_134] : memref<1x2x128xf32, #tpu.memory_space<vmem>>, vector<1x2x128xf32>
    %538 = vector.shape_cast %537 : vector<1x2x128xf32> to vector<2x128xf32>
    %539 = vector.shape_cast %536 : vector<2x128xf32> to vector<1x2x128xf32>
    tpu.vector_store %arg5[%c0_132, %c0_133, %c0_134], %539 {strides = array<i32>} : memref<1x2x128xf32, #tpu.memory_space<vmem>>, vector<1x2x128xf32>,
    %c0_135 = arith.constant 0 : index
    %c0_136 = arith.constant 0 : index
    %c0_137 = arith.constant 0 : index
    %540 = vector.load %arg6[%c0_135, %c0_136, %c0_137] : memref<2x2x16xf32, #tpu.memory_space<vmem>>, vector<1x2x16xf32>
    %541 = vector.shape_cast %540 : vector<1x2x16xf32> to vector<2x16xf32>
    %542 = vector.shape_cast %500 : vector<2x16xf32> to vector<1x2x16xf32>
    tpu.vector_store %arg6[%c0_135, %c0_136, %c0_137], %542 {strides = array<i32>} : memref<2x2x16xf32, #tpu.memory_space<vmem>>, vector<1x2x16xf32>,
    %c0_138 = arith.constant 0 : index
    %c0_139 = arith.constant 0 : index
    %c0_140 = arith.constant 0 : index
    %543 = vector.load %arg7[%c0_138, %c0_139, %c0_140] : memref<2x2x16xf32, #tpu.memory_space<vmem>>, vector<1x2x16xf32>
    %544 = vector.shape_cast %543 : vector<1x2x16xf32> to vector<2x16xf32>
    %545 = vector.shape_cast %498 : vector<2x16xf32> to vector<1x2x16xf32>
    tpu.vector_store %arg7[%c0_138, %c0_139, %c0_140], %545 {strides = array<i32>} : memref<2x2x16xf32, #tpu.memory_space<vmem>>, vector<1x2x16xf32>,
    %c1_141 = arith.constant 1 : index
    %c0_142 = arith.constant 0 : index
    %c0_143 = arith.constant 0 : index
    %546 = vector.load %arg6[%c1_141, %c0_142, %c0_143] : memref<2x2x16xf32, #tpu.memory_space<vmem>>, vector<1x2x16xf32>
    %547 = vector.shape_cast %546 : vector<1x2x16xf32> to vector<2x16xf32>
    %548 = vector.shape_cast %531 : vector<2x16xf32> to vector<1x2x16xf32>
    tpu.vector_store %arg6[%c1_141, %c0_142, %c0_143], %548 {strides = array<i32>} : memref<2x2x16xf32, #tpu.memory_space<vmem>>, vector<1x2x16xf32>,
    %c1_144 = arith.constant 1 : index
    %c0_145 = arith.constant 0 : index
    %c0_146 = arith.constant 0 : index
    %549 = vector.load %arg7[%c1_144, %c0_145, %c0_146] : memref<2x2x16xf32, #tpu.memory_space<vmem>>, vector<1x2x16xf32>
    %550 = vector.shape_cast %549 : vector<1x2x16xf32> to vector<2x16xf32>
    %551 = vector.shape_cast %529 : vector<2x16xf32> to vector<1x2x16xf32>
    tpu.vector_store %arg7[%c1_144, %c0_145, %c0_146], %551 {strides = array<i32>} : memref<2x2x16xf32, #tpu.memory_space<vmem>>, vector<1x2x16xf32>,
    return
  }
  func.func @transform_0(%arg0: i32) -> (i32, i32, i32) {
    %c0_i32 = arith.constant 0 : i32
    %c0_i32_0 = arith.constant 0 : i32
    %c0_i32_1 = arith.constant 0 : i32
    return %arg0, %c0_i32, %c0_i32_0 : i32, i32, i32
  }
  func.func @transform_1(%arg0: i32) -> (i32, i32, i32) {
    %c2_i32 = arith.constant 2 : i32
    %0 = arith.subi %c2_i32, %arg0 : i32
    %c0_i32 = arith.constant 0 : i32
    %c0_i32_0 = arith.constant 0 : i32
    %c0_i32_1 = arith.constant 0 : i32
    return %0, %c0_i32, %c0_i32_0 : i32, i32, i32
  }
  func.func @transform_2(%arg0: i32) -> (i32, i32, i32) {
    %c0_i32 = arith.constant 0 : i32
    %c0_i32_0 = arith.constant 0 : i32
    %c0_i32_1 = arith.constant 0 : i32
    %c0_i32_2 = arith.constant 0 : i32
    return %c0_i32, %c0_i32_0, %c0_i32_1 : i32, i32, i32
  }
  func.func @transform_3(%arg0: i32) -> (i32, i32, i32) {
    %c0_i32 = arith.constant 0 : i32
    %c0_i32_0 = arith.constant 0 : i32
    %c0_i32_1 = arith.constant 0 : i32
    return %arg0, %c0_i32, %c0_i32_0 : i32, i32, i32
  }
  func.func @transform_4(%arg0: i32) -> (i32, i32, i32) {
    %c2_i32 = arith.constant 2 : i32
    %0 = arith.subi %c2_i32, %arg0 : i32
    %c0_i32 = arith.constant 0 : i32
    %c0_i32_0 = arith.constant 0 : i32
    %c0_i32_1 = arith.constant 0 : i32
    return %0, %c0_i32, %c0_i32_0 : i32, i32, i32
  }
}

</mosaic_0001>

<bundles_post_ra>
// kernel: baseline_encoder_forward.5
= control target key start
LH: loop header
LB: loop body
LE: loop exit
PB: predicated region body
PF: predicated region fallthrough
CT: control target
= control target key end

     0   :  { %v113_v0 = vmov 0.0   ;;  %vm114_vm0 = vmmov 0   ;;  %vm39_vm1 = vcmask 392192   ;;  %s151_s1 = inlined_call_operand.vmem [shape: bf16[48,128], index: 1, kind: input, shape index: {}]   ;;  %s152_s0 = inlined_call_operand.vmem [shape: f32[16,48], index: 0, kind: input, shape index: {}]   ;;  %s153_s2 = inlined_call_operand.vmem [shape: f32[16,128], index: 2, kind: output, shape index: {}]  }
   0x1   :  { %98 = vmatprep.subr.bf16.mxu0 %v113_v0  ;;  %v110_v1 = vld [vmem:[%s151_s1 + $0x10] sm:$0xff]   ;;  %104 = vmatprep.mubr.msk.bf16.mxu0 %vm114_vm0, %v113_v0  ;;  %v111_v2 = vld [vmem:[%s151_s1 + $0x8] sm:$0xff]   ;;  %v112_v3 = vld [vmem:[%s151_s1] sm:$0xff]  }
   0x2   :  { %99 = vmatpush3.bf16.msra.mxu0 %v110_v1  ;;  %v12_v4 = vld [vmem:[%s152_s0] sm:$0xff]  ;;  %v13_v5 = vld [vmem:[%s152_s0 + $0x8] sm:$0xff] }
   0x3   :  { %100 = vmatprep.subr.bf16.mxu0 %v113_v0  ;;  %v14_v6 = vpack.c.bf16 %v13_v5, %v12_v4 }
   0x6   :  { %101 = vmatpush3.bf16.msra.mxu0 %v111_v2 }
   0x7   :  { %102 = vmatprep.subr.bf16.mxu0 %v113_v0 }
   0xa   :  { %103 = vmatpush3.bf16.msra.mxu0 %v112_v3 }
   0xd   :  { %105 = vmatmul.mubr.msk.bf16.vlgmr.msra.gmra.mxu0 %vm39_vm1, %v14_v6 }
  0xcd   :  { %v77_v7 = vpop.f32.mrf.mxu0 }
  0xce   :  { %84 = vst [vmem:[%s153_s2] sm:$0xff] %v77_v7 }
  0xcf   :  { %v106_v8 = vpop.f32.mrf.mxu0 }
  0xd1   :  { %v80_v9 = vpop.f32.mrf.mxu0 }
  0xd2   :  { %85 = vst [vmem:[%s153_s2 + $0x8] sm:$0xff] %v80_v9 }
  0xd3   :  { %v107_v10 = vpop.f32.mrf.mxu0 }

// kernel: baseline_encoder_forward.6
= control target key start
LH: loop header
LB: loop body
LE: loop exit
PB: predicated region body
PF: predicated region fallthrough
CT: control target
= control target key end

     0   :  { %v159_v0 = vmov 0.0   ;;  %vm160_vm0 = vmmov 0   ;;  %vm47_vm1 = vcmask 261120   ;;  %s229_s1 = inlined_call_operand.vmem [shape: bf16[32,128], index: 1, kind: input, shape index: {}]   ;;  %s230_s0 = inlined_call_operand.vmem [shape: f32[48,32], index: 0, kind: input, shape index: {}]   ;;  %s231_s2 = inlined_call_operand.vmem [shape: f32[1,128], index: 2, kind: input, shape index: {}]   ;;  %s232_s3 = inlined_call_operand.vmem [shape: f32[48,128], index: 3, kind: output, shape index: {}]  }
   0x1   :  { %151 = vmatprep.subr.bf16.mxu1 %v159_v0  ;;  %v157_v1 = vld [vmem:[%s229_s1 + $0x8] sm:$0xff]   ;;  %135 = vmatprep.subr.bf16.mxu0 %v159_v0  ;;  %v158_v2 = vld [vmem:[%s229_s1] sm:$0xff]   ;;  %v17_v3 = vld [vmem:[%s230_s0 + $0x10] sm:$0xff] }
   0x2   :  { %143 = vmatprep.mubr.msk.bf16.mxu1 %vm160_vm0, %v159_v0  ;;  %139 = vmatprep.mubr.msk.bf16.mxu0 %vm160_vm0, %v159_v0  ;;  %v18_v4 = vld [vmem:[%s230_s0 + $0x18] sm:$0xff]  ;;  %v15_v5 = vld [vmem:[%s230_s0] sm:$0xff]  ;;  %v16_v6 = vld [vmem:[%s230_s0 + $0x8] sm:$0xff] }
   0x3   :  { %153 = vmatpush3.bf16.msra.mxu1 %v157_v1  ;;  %136 = vmatpush3.bf16.msra.mxu0 %v157_v1  ;;  %v22_v7 = vpack.c.bf16 %v18_v4, %v17_v3  ;;  %v21_v8 = vpack.c.bf16 %v16_v6, %v15_v5  ;;  %v19_v9 = vld [vmem:[%s230_s0 + $0x20] sm:$0xff]  ;;  %v20_v10 = vld [vmem:[%s230_s0 + $0x28] sm:$0xff] }
   0x4   :  { %152 = vmatprep.subr.bf16.mxu1 %v159_v0  ;;  %137 = vmatprep.subr.bf16.mxu0 %v159_v0  ;;  %v23_v11 = vpack.c.bf16 %v20_v10, %v19_v9  ;;  %v124_v12 = vld [vmem:[%s231_s2] ss:$0 sm:$0xff] }
   0x7   :  { %154 = vmatpush3.bf16.msra.mxu1 %v158_v2  ;;  %138 = vmatpush3.bf16.msra.mxu0 %v158_v2 }
   0xa   :  { %144 = vmatmul.mubr.msk.bf16.vlgmr.msra.gmra.mxu1 %vm47_vm1, %v22_v7  ;;  %140 = vmatmul.mubr.msk.bf16.vlgmr.msra.gmra.mxu0 %vm47_vm1, %v21_v8 }
   0xb   :  { %147 = vmatprep.mubr.msk.bf16.mxu1 %vm160_vm0, %v159_v0 }
  0x12   :  { %148 = vmatmul.mubr.msk.bf16.gmra.mxu1 %vm47_vm1, %v23_v11 }
  0xca   :  { %v99_v13 = vpop.f32.mrf.mxu1  ;;  %v91_v14 = vpop.f32.mrf.mxu0 }
  0xcb   :  { %v100_v15 = vadd.f32 %v124_v12, %v99_v13  ;;  %v92_v16 = vadd.f32 %v124_v12, %v91_v14 }
  0xcc   :  { %v145_v17 = vpop.f32.mrf.mxu1  ;;  %v141_v18 = vpop.f32.mrf.mxu0 }
  0xcd   :  { %116 = vst [vmem:[%s232_s3 + $0x10] sm:$0xff] %v100_v15  ;;  %114 = vst [vmem:[%s232_s3] sm:$0xff] %v92_v16 }
  0xce   :  { %v102_v19 = vpop.f32.mrf.mxu1  ;;  %v94_v20 = vpop.f32.mrf.mxu0 }
  0xcf   :  { %v103_v21 = vadd.f32 %v124_v12, %v102_v19  ;;  %v95_v22 = vadd.f32 %v124_v12, %v94_v20 }
  0xd0   :  { %v146_v23 = vpop.f32.mrf.mxu1  ;;  %v142_v24 = vpop.f32.mrf.mxu0 }
  0xd1   :  { %117 = vst [vmem:[%s232_s3 + $0x18] sm:$0xff] %v103_v21  ;;  %115 = vst [vmem:[%s232_s3 + $0x8] sm:$0xff] %v95_v22 }
  0xd2   :  { %v107_v25 = vpop.f32.mrf.mxu1 }
  0xd3   :  { %v108_v26 = vadd.f32 %v124_v12, %v107_v25 }
  0xd4   :  { %v149_v27 = vpop.f32.mrf.mxu1 }
  0xd5   :  { %118 = vst [vmem:[%s232_s3 + $0x20] sm:$0xff] %v108_v26 }
  0xd6   :  { %v110_v28 = vpop.f32.mrf.mxu1 }
  0xd7   :  { %v111_v29 = vadd.f32 %v124_v12, %v110_v28 }
  0xd8   :  { %v150_v30 = vpop.f32.mrf.mxu1 }
  0xd9   :  { %119 = vst [vmem:[%s232_s3 + $0x28] sm:$0xff] %v111_v29 }

// kernel: baseline_encoder_forward.7
= control target key start
LH: loop header
LB: loop body
LE: loop exit
PB: predicated region body
PF: predicated region fallthrough
CT: control target
= control target key end

     0   :  { %s2091_s15 = smov 0   ;;  %s2520_s0 = inlined_call_operand.vmem [shape: f32[24,2,128], index: 0, kind: input, shape index: {}, may-alias: {0,1}]   ;;  %s2521_s1 = inlined_call_operand.vmem [shape: f32[24,2,128], index: 1, kind: input, shape index: {}, may-alias: {0,1}]   ;;  %s2522_s2 = inlined_call_operand.vmem [shape: bf16[2,16,64], index: 2, kind: input, shape index: {}]   ;;  %s2523_s3 = inlined_call_operand.vmem [shape: f32[3,2,128], index: 3, kind: output, shape index: {0}]   ;;  %s2524_s4 = inlined_call_operand.vmem [shape: f32[3,2,128], index: 4, kind: output, shape index: {1}]  }
   0x1 LB: > { %s2097_s16 = sadd.s32 4294967295, %s2054_s15   ;;  %p1712_p0 = scmp.ge.s32.totalorder %s2054_s15, 1  ;;  %s2054_s15 = sphi %s2091_s15, %s15_s15  }
   0x2   : > { %p183_p1 = scmp.lt.s32.totalorder %s2054_s15, 4 }
   0x4   : > { %p184_p2 = pnand %p1712_p0, %p183_p1 }
   0x5   : > { %s1713_s17 = sshll.u32 (!%p184_p2), %s2097_s16, 3  ;;  %s225_s18 = ssub.s32 (!%p184_p2), 2, %s2097_s16 }
   0x6   : > { %187 = sbr.rel (%p184_p2) target bundleno = 6493 (0x195d), region = 32  ;;  %p220_p3 = scmp.lt.s32.totalorder (!%p184_p2), %s1713_s17, 23 }
   0x7   : > { %s1715_s19 = sshll.u32 (!%p184_p2), %s225_s18, 3  ;;  %p233_p5 = scmp.lt.s32.totalorder (!%p184_p2), %s2097_s16, 2 }
   0x8   : > { %p227_p4 = scmp.lt.s32.totalorder (!%p184_p2), %s1715_s19, 23  ;;  %p238_p6 = scmp.lt.s32.totalorder (!%p184_p2), %s225_s18, 2 }
   0x9   : > { %p1719_p7 = scmp.ne.s32.totalorder (!%p184_p2), %s2097_s16, 0 }
   0xb   : > { %s2528_s17 = smov (!%p220_p3, %s1713_s17), 23  ;;  %s2530_s19 = smov (!%p227_p4, %s1715_s19), 23 }
   0xc   : > { %s1714_s20 = sshll.u32 %s2528_s17, 1  ;;  %s1716_s24 = sshll.u32 %s2530_s19, 1 }
   0xd   : > { %s2107_s23 = scalar_lea.vmem %s2520_s0, %s1714_s20  ;;  %s2112_s27 = scalar_lea.vmem %s2521_s1, %s1716_s24 }
   0xe   : > { %s234_s28 = scalar_select %p233_p5, %s2097_s16, 2 }
   0xf   : > { %s2532_s18 = smov (!%p238_p6, %s225_s18), 2  ;;  %247 = sbr.rel (%p1719_p7) target bundleno = 23 (0x17), region = 36 }
  0x10   : > { %s1717_s29 = sshll.u32 %s234_s28, 1  ;;  %s1718_s7 = sshll.u32 %s2532_s18, 1 }
  0x11   : > { %s2118_s6 = scalar_lea.vmem %s2523_s3, %s1717_s29  ;;  %s2123_s10 = scalar_lea.vmem %s2524_s4, %s1718_s7 }
  0x14   : > { %vm248_vm0 = vcmask 123904   ;;  %v2056_v0 = vmov 0.0  }
  0x15   : > { %249 = vst.msk [vmem:[#allocation2] sm:$0x3] %vm248_vm0, %v2056_v0  ;;  %250 = vst.msk [vmem:[#allocation2 + $0x2] sm:$0x3] %vm248_vm0, %v2056_v0 }
  0x16   : > { %251 = vst.msk [vmem:[#allocation3] sm:$0x3] %vm248_vm0, %v2056_v0  ;;  %252 = vst.msk [vmem:[#allocation3 + $0x2] sm:$0x3] %vm248_vm0, %v2056_v0 }
  0x17 PF: > { %v2129_v1 = vld [vmem:[%s2522_s2 + $0x8] sm:$0xff]   ;;  %v2057_v2 = vmov 0.0   ;;  %vm2058_vm1 = vmmov 0   ;;  %vm272_vm2 = vcmask 130048   ;;  %s2059_s13 = smov 80   ;;  %s2060_s14 = smov 64  }
  0x18   : > { %1810 = vmatprep.subr.bf16.mxu1 %v2057_v2  ;;  %1804 = vmatprep.subr.bf16.mxu0 %v2057_v2  ;;  %v1725_v10 = vld [vmem:[%s2112_s27 + $0xe] sm:$0x3]  ;;  %s2061_s17 = smov 96   ;;  %s2062_s18 = smov 16   ;;  %v2152_v20 = vld [vmem:[%s2522_s2] sm:$0xff]   ;;  %vm1544_vm4 = vcmask 261120  }
  0x19   : > { %1811 = vmatpush3.bf16.msra.mxu1 %v2129_v1  ;;  %1812 = vmatprep.mubr.msk.bf16.mxu1 %vm2058_vm1, %v2057_v2  ;;  %s2063_s21 = smov 112   ;;  %s2064_s22 = smov 32   ;;  %v264_v28 = vld [vmem:[%s2107_s23] sm:$0x3]  ;;  %v1732_v54 = vld [vmem:[%s2112_s27 + $0xc] sm:$0x3] }
  0x1a   : > { %1806 = vmatprep.mubr.msk.bf16.mxu0 %vm2058_vm1, %v2057_v2  ;;  %1822 = vmatprep.subr.bf16.mxu1 %v2057_v2  ;;  %p430_p8 = scmp.gt.s32.totalorder %s2097_s16, 0  ;;  %s2065_s16 = smov 48   ;;  %vm1546_vm5 = vcmask 392192   ;;  %vm1548_vm6 = vcmask 523264   ;;  %vm1596_vm7 = vcmask 123904   ;;  %vm1550_vm8 = vcmask 654336  }
  0x1b   : > { %1805 = vmatpush3.bf16.msra.mxu0 %v2152_v20  ;;  %vm1552_vm9 = vcmask 785408   ;;  %vm1554_vm10 = vcmask 916480  }
  0x1c   : > { %v261_v3 = vld [vmem:[#allocation2 + $0x2] sm:$0x3]  ;;  %v258_v21 = vld [vmem:[#allocation2] sm:$0x3]  ;;  %1816 = vmatprep.subr.bf16.mxu0 %v2057_v2  ;;  %s431_s24 = scalar_select %p430_p8, 1, 0 }
  0x1d   : > { %v347_v4 = vpack.c.bf16 %v261_v3, %v261_v3  ;;  %v263_v5 = vld [vmem:[#allocation3 + $0x2] sm:$0x3]  ;;  %v265_v22 = vpack.c.bf16 %v258_v21, %v258_v21  ;;  %v259_v43 = vld [vmem:[#allocation3] sm:$0x3]  ;;  %v1729_v21 = vld [vmem:[%s2107_s23 + $0x2] sm:$0x3] }
  0x1e   : > { %410 = vrot.lane.b32.xlu1 %v263_v5, %s2059_s13  ;;  %v432_v33 = vstv %s431_s24 }
  0x1f   : > { %1813 = vmatmul.mubr.msk.bf16.vlgmr.msra.gmra.mxu1 %vm272_vm2, %v347_v4  ;;  %1807 = vmatmul.mubr.msk.bf16.vlgmr.msra.gmra.mxu0 %vm272_vm2, %v265_v22  ;;  %vm2171_vm3 = vcmp.eq.s32.totalorder %v432_v33, 1 }
  0x20   : > { %1823 = vmatpush3.bf16.msra.mxu1 %v2129_v1  ;;  %1824 = vmatprep.mubr.msk.bf16.mxu1 %vm2058_vm1, %v2057_v2 }
  0x21   : > { %1834 = vmatprep.subr.bf16.mxu1 %v2057_v2  ;;  %1817 = vmatpush3.bf16.msra.mxu0 %v2152_v20 }
  0x22   : > { %1818 = vmatprep.mubr.msk.bf16.mxu0 %vm2058_vm1, %v2057_v2  ;;  %1828 = vmatprep.subr.bf16.mxu0 %v2057_v2 }
  0x90   : > { %v2162_v23 = vpop.permute.xlu1 %410 }
  0xdf   : > { %v391_v6 = vpop.f32.mrf.mxu1  ;;  %v310_v29 = vpop.f32.mrf.mxu0 }
  0xe0   : > { %398 = vrot.lane.b32.xlu0 %v391_v6, %s2060_s14  ;;  %v316_v30 = vadd.f32 %v310_v29, %v264_v28 }
  0xe1   : > { %v1814_v7 = vpop.f32.mrf.mxu1  ;;  %v1808_v31 = vpop.f32.mrf.mxu0 }
  0xe2   : > { %v1724_v44 = vmul.f32 -1.442695, %v316_v30 }
  0xe3   : > { %v394_v8 = vpop.f32.mrf.mxu1  ;;  %v313_v32 = vpop.f32.mrf.mxu0 }
  0xe5   : > { %v1815_v9 = vpop.f32.mrf.mxu1  ;;  %v1809_v34 = vpop.f32.mrf.mxu0 }
 0x152   : > { %v399_v11 = vpop.permute.xlu0 %398 }
 0x153   : > { %v401_v12 = vadd.f32 %v1725_v10, %v399_v11 }
 0x155   : > { %1920 = vtanh.f32 %v401_v12  ;;  %v1728_v14 = vmul.f32 -1.442695, %v401_v12 }
 0x157   : > { %1922 = vpow2.f32 %v1728_v14 }
 0x162   : > { %v1921_v13 = vpop.eup %1920 }
 0x163   : > { %415 = vrot.lane.b32.xlu0 %v1921_v13, %s2061_s17 }
 0x164   : > { %v1923_v15 = vpop.eup %1922 }
 0x165   : > { %v405_v16 = vadd.f32 1.0, %v1923_v15 }
 0x167   : > { %1924 = vrcp.f32 %v405_v16 }
 0x174   : > { %v1925_v17 = vpop.eup %1924 }
 0x175   : > { %v413_v24 = vmul.f32 %v1925_v17, %v2162_v23 }
 0x1d5   : > { %v416_v18 = vpop.permute.xlu0 %415 }
 0x1d6   : > { %v418_v19 = vmul.f32 %v1925_v17, %v416_v18 }
 0x1d8   : > { %420 = vrot.lane.b32.xlu1 %v418_v19, %s2062_s18 }
 0x1dc   : > { %435 = vrot.lane.b32.xlu1 %v261_v3, %s2063_s21 }
 0x24a   : > { %v421_v25 = vpop.permute.xlu1 %420 }
 0x24b   : > { %v2165_v26 = vadd.f32 %v421_v25, %v413_v24 }
 0x24d   : > { %1926 = vtanh.f32 %v2165_v26  ;;  %v2204_v10 = vsel %vm2171_vm3, %v2165_v26, %v2162_v23 }
 0x24e   : > { %1928 = vtanh.f32 %v316_v30  ;;  %v436_v36 = vpop.permute.xlu1 %435 }
 0x24f   : > { %1930 = vpow2.f32 %v1724_v44 }
 0x25a   : > { %v1927_v27 = vpop.eup %1926 }
 0x25b   : > { %426 = vrot.lane.b32.xlu0 %v1927_v27, %s2064_s22  ;;  %v1929_v41 = vpop.eup %1928 }
 0x25c   : > { %330 = vrot.lane.b32.xlu1 %v1929_v41, %s2061_s17  ;;  %v1931_v45 = vpop.eup %1930 }
 0x25d   : > { %v320_v46 = vadd.f32 1.0, %v1931_v45  ;;  %v1738_v45 = vld [vmem:[%s2112_s27 + $0xa] sm:$0x3] }
 0x25f   : > { %1932 = vrcp.f32 %v320_v46 }
 0x260   : > { %325 = vrot.lane.b32.xlu1 %v259_v43, %s2062_s18 }
 0x26c   : > { %v1933_v47 = vpop.eup %1932 }
 0x2cd   : > { %v427_v35 = vpop.permute.xlu0 %426 }
 0x2ce   : > { %v429_v37 = vmul.f32 %v1925_v17, %v427_v35  ;;  %v331_v48 = vpop.permute.xlu1 %330 }
 0x2cf   : > { %v333_v50 = vmul.f32 %v1933_v47, %v331_v48 }
 0x2d0   : > { %v2177_v39 = vsel %vm2171_vm3, %v429_v37, %v436_v36 }
 0x2d1   : > { %v516_v40 = vpack.c.bf16 %v2177_v39, %v2177_v39 }
 0x2d2   : > { %v326_v55 = vpop.permute.xlu1 %325 }
 0x2d3   : > { %518 = vrot.lane.b32.xlu0 %v516_v40, %s2062_s18  ;;  %v328_v58 = vmul.f32 %v1933_v47, %v326_v55 }
 0x345   : > { %v519_v42 = vpop.permute.xlu0 %518 }
 0x346   : > { %1825 = vmatmul.mubr.msk.bf16.vlgmr.msra.gmra.mxu1 %vm272_vm2, %v519_v42 }
 0x347   : > { %1835 = vmatpush3.bf16.msra.mxu1 %v2129_v1  ;;  %1836 = vmatprep.mubr.msk.bf16.mxu1 %vm2058_vm1, %v2057_v2 }
 0x348   : > { %1846 = vmatprep.subr.bf16.mxu1 %v2057_v2 }
 0x406   : > { %v557_v49 = vpop.f32.mrf.mxu1 }
 0x407   : > { %564 = vrot.lane.b32.xlu0 %v557_v49, %s2060_s14 }
 0x408   : > { %v1826_v51 = vpop.f32.mrf.mxu1 }
 0x40a   : > { %v560_v52 = vpop.f32.mrf.mxu1 }
 0x40b   : > { %335 = vrot.lane.b32.xlu0 %v333_v50, %s2062_s18 }
 0x40c   : > { %v1827_v53 = vpop.f32.mrf.mxu1 }
 0x479   : > { %v565_v56 = vpop.permute.xlu0 %564 }
 0x47a   : > { %v567_v57 = vadd.f32 %v1732_v54, %v565_v56 }
 0x47c   : > { %1934 = vtanh.f32 %v567_v57  ;;  %v1734_v63 = vmul.f32 -1.442695, %v567_v57 }
 0x47d   : > { %v336_v59 = vpop.permute.xlu0 %335 }
 0x47e   : > { %v338_v60 = vadd.f32 %v336_v59, %v328_v58 }
 0x480   : > { %1936 = vtanh.f32 %v338_v60 }
 0x481   : > { %1938 = vpow2.f32 %v1734_v63 }
 0x489   : > { %v1935_v61 = vpop.eup %1934 }
 0x48a   : > { %577 = vrot.lane.b32.xlu1 %v1935_v61, %s2061_s17 }
 0x48d   : > { %v1937_v62 = vpop.eup %1936 }
 0x48e   : > { %341 = vrot.lane.b32.xlu0 %v1937_v62, %s2064_s22  ;;  %v1939_v0 = vpop.eup %1938 }
 0x48f   : > { %v571_v3 = vadd.f32 1.0, %v1939_v0  ;;  %v1735_v0 = vld [vmem:[%s2107_s23 + $0x4] sm:$0x3] }
 0x491   : > { %1940 = vrcp.f32 %v571_v3 }
 0x49e   : > { %v1941_v4 = vpop.eup %1940 }
 0x49f   : > { %v575_v11 = vmul.f32 %v1941_v4, %v2204_v10 }
 0x4fc   : > { %v578_v5 = vpop.permute.xlu1 %577 }
 0x4fd   : > { %v580_v6 = vmul.f32 %v1941_v4, %v578_v5 }
 0x4ff   : > { %582 = vrot.lane.b32.xlu1 %v580_v6, %s2062_s18 }
 0x500   : > { %v342_v7 = vpop.permute.xlu0 %341 }
 0x501   : > { %v2195_v8 = vmul.f32 %v1933_v47, %v342_v7 }
 0x503   : > { %v442_v9 = vpack.c.bf16 %v2195_v8, %v2195_v8 }
 0x505   : > { %444 = vrot.lane.b32.xlu0 %v442_v9, %s2059_s13 }
 0x571   : > { %v583_v12 = vpop.permute.xlu1 %582 }
 0x572   : > { %v2207_v13 = vadd.f32 %v583_v12, %v575_v11 }
 0x574   : > { %1942 = vtanh.f32 %v2207_v13  ;;  %v2254_v59 = vsel %vm2171_vm3, %v2207_v13, %v2204_v10 }
 0x577   : > { %v445_v14 = vpop.permute.xlu0 %444 }
 0x578   : > { %1819 = vmatmul.mubr.msk.bf16.vlgmr.msra.gmra.mxu0 %vm272_vm2, %v445_v14 }
 0x579   : > { %1829 = vmatpush3.bf16.msra.mxu0 %v2152_v20  ;;  %1830 = vmatprep.mubr.msk.bf16.mxu0 %vm2058_vm1, %v2057_v2 }
 0x57a   : > { %1840 = vmatprep.subr.bf16.mxu0 %v2057_v2 }
 0x581   : > { %v1943_v15 = vpop.eup %1942 }
 0x582   : > { %588 = vrot.lane.b32.xlu1 %v1943_v15, %s2064_s22 }
 0x5f4   : > { %v589_v16 = vpop.permute.xlu1 %588 }
 0x5f5   : > { %v591_v17 = vmul.f32 %v1941_v4, %v589_v16 }
 0x5f7   : > { %v2219_v18 = vsel %vm2171_vm3, %v591_v17, %v2177_v39 }
 0x5f8   : > { %v670_v19 = vpack.c.bf16 %v2219_v18, %v2219_v18 }
 0x5fa   : > { %672 = vrot.lane.b32.xlu0 %v670_v19, %s2062_s18 }
 0x638   : > { %v483_v22 = vpop.f32.mrf.mxu0 }
 0x639   : > { %v489_v23 = vadd.f32 %v1729_v21, %v483_v22 }
 0x63a   : > { %v1820_v24 = vpop.f32.mrf.mxu0 }
 0x63b   : > { %1944 = vtanh.f32 %v489_v23  ;;  %v1731_v29 = vmul.f32 -1.442695, %v489_v23 }
 0x63c   : > { %v486_v25 = vpop.f32.mrf.mxu0 }
 0x63d   : > { %1946 = vpow2.f32 %v1731_v29 }
 0x63e   : > { %v1821_v26 = vpop.f32.mrf.mxu0 }
 0x648   : > { %v1945_v27 = vpop.eup %1944 }
 0x649   : > { %499 = vrot.lane.b32.xlu1 %v1945_v27, %s2061_s17 }
 0x64a   : > { %v1947_v30 = vpop.eup %1946 }
 0x64b   : > { %v493_v31 = vadd.f32 1.0, %v1947_v30 }
 0x64d   : > { %1948 = vrcp.f32 %v493_v31 }
 0x65a   : > { %v1949_v32 = vpop.eup %1948 }
 0x65b   : > { %v497_v37 = vmul.f32 %v1949_v32, %v338_v60 }
 0x66c   : > { %v673_v28 = vpop.permute.xlu0 %672 }
 0x66d   : > { %1837 = vmatmul.mubr.msk.bf16.vlgmr.msra.gmra.mxu1 %vm272_vm2, %v673_v28 }
 0x66e   : > { %1847 = vmatpush3.bf16.msra.mxu1 %v2129_v1  ;;  %1848 = vmatprep.mubr.msk.bf16.mxu1 %vm2058_vm1, %v2057_v2 }
 0x66f   : > { %1858 = vmatprep.subr.bf16.mxu1 %v2057_v2 }
 0x6bb   : > { %v500_v33 = vpop.permute.xlu1 %499 }
 0x6bc   : > { %v502_v34 = vmul.f32 %v1949_v32, %v500_v33 }
 0x6be   : > { %504 = vrot.lane.b32.xlu0 %v502_v34, %s2062_s18  ;;  %v1744_v34 = vld [vmem:[%s2112_s27 + $0x8] sm:$0x3] }
 0x72d   : > { %v711_v35 = vpop.f32.mrf.mxu1 }
 0x72e   : > { %718 = vrot.lane.b32.xlu1 %v711_v35, %s2060_s14 }
 0x72f   : > { %v1838_v36 = vpop.f32.mrf.mxu1 }
 0x730   : > { %v505_v40 = vpop.permute.xlu0 %504 }
 0x731   : > { %v2233_v41 = vadd.f32 %v505_v40, %v497_v37  ;;  %v714_v42 = vpop.f32.mrf.mxu1 }
 0x733   : > { %1950 = vtanh.f32 %v2233_v41  ;;  %v1839_v43 = vpop.f32.mrf.mxu1 }
 0x740   : > { %v1951_v44 = vpop.eup %1950 }
 0x741   : > { %510 = vrot.lane.b32.xlu0 %v1951_v44, %s2064_s22 }
 0x7a0   : > { %v719_v46 = vpop.permute.xlu1 %718 }
 0x7a1   : > { %v721_v47 = vadd.f32 %v1738_v45, %v719_v46 }
 0x7a3   : > { %1952 = vtanh.f32 %v721_v47  ;;  %v1740_v52 = vmul.f32 -1.442695, %v721_v47 }
 0x7a5   : > { %1954 = vpow2.f32 %v1740_v52 }
 0x7b0   : > { %v1953_v48 = vpop.eup %1952 }
 0x7b1   : > { %731 = vrot.lane.b32.xlu1 %v1953_v48, %s2061_s17 }
 0x7b2   : > { %v1955_v53 = vpop.eup %1954 }
 0x7b3   : > { %v511_v49 = vpop.permute.xlu0 %510  ;;  %v725_v54 = vadd.f32 1.0, %v1955_v53 }
 0x7b4   : > { %v2239_v50 = vmul.f32 %v1949_v32, %v511_v49 }
 0x7b5   : > { %1956 = vrcp.f32 %v725_v54  ;;  %v1741_v54 = vld [vmem:[%s2107_s23 + $0x6] sm:$0x3] }
 0x7b6   : > { %v596_v51 = vpack.c.bf16 %v2239_v50, %v2239_v50 }
 0x7b8   : > { %598 = vrot.lane.b32.xlu0 %v596_v51, %s2059_s13 }
 0x7c2   : > { %v1957_v55 = vpop.eup %1956 }
 0x7c3   : > { %v729_v60 = vmul.f32 %v1957_v55, %v2254_v59 }
 0x823   : > { %v732_v56 = vpop.permute.xlu1 %731 }
 0x824   : > { %v734_v57 = vmul.f32 %v1957_v55, %v732_v56 }
 0x826   : > { %736 = vrot.lane.b32.xlu1 %v734_v57, %s2062_s18 }
 0x82a   : > { %v599_v58 = vpop.permute.xlu0 %598 }
 0x82b   : > { %1831 = vmatmul.mubr.msk.bf16.vlgmr.msra.gmra.mxu0 %vm272_vm2, %v599_v58 }
 0x82c   : > { %1841 = vmatpush3.bf16.msra.mxu0 %v2152_v20  ;;  %1842 = vmatprep.mubr.msk.bf16.mxu0 %vm2058_vm1, %v2057_v2 }
 0x82d   : > { %1852 = vmatprep.subr.bf16.mxu0 %v2057_v2 }
 0x898   : > { %v737_v61 = vpop.permute.xlu1 %736 }
 0x899   : > { %v2257_v62 = vadd.f32 %v737_v61, %v729_v60 }
 0x89b   : > { %1958 = vtanh.f32 %v2257_v62  ;;  %v2300_v52 = vsel %vm2171_vm3, %v2257_v62, %v2254_v59 }
 0x8a8   : > { %v1959_v63 = vpop.eup %1958 }
 0x8a9   : > { %742 = vrot.lane.b32.xlu0 %v1959_v63, %s2064_s22 }
 0x8eb   : > { %v637_v3 = vpop.f32.mrf.mxu0 }
 0x8ec   : > { %v643_v4 = vadd.f32 %v1735_v0, %v637_v3 }
 0x8ed   : > { %v1832_v5 = vpop.f32.mrf.mxu0 }
 0x8ee   : > { %1960 = vtanh.f32 %v643_v4  ;;  %v1737_v14 = vmul.f32 -1.442695, %v643_v4 }
 0x8ef   : > { %v640_v6 = vpop.f32.mrf.mxu0 }
 0x8f0   : > { %1962 = vpow2.f32 %v1737_v14 }
 0x8f1   : > { %v1833_v7 = vpop.f32.mrf.mxu0 }
 0x8fb   : > { %v1961_v9 = vpop.eup %1960 }
 0x8fc   : > { %653 = vrot.lane.b32.xlu0 %v1961_v9, %s2061_s17 }
 0x8fd   : > { %v1963_v15 = vpop.eup %1962 }
 0x8fe   : > { %v647_v16 = vadd.f32 1.0, %v1963_v15 }
 0x900   : > { %1964 = vrcp.f32 %v647_v16 }
 0x90d   : > { %v1965_v17 = vpop.eup %1964 }
 0x90e   : > { %v651_v23 = vmul.f32 %v1965_v17, %v2233_v41 }
 0x91b   : > { %v743_v10 = vpop.permute.xlu0 %742 }
 0x91c   : > { %v745_v11 = vmul.f32 %v1957_v55, %v743_v10 }
 0x91e   : > { %v2266_v12 = vsel %vm2171_vm3, %v745_v11, %v2219_v18 }
 0x91f   : > { %v824_v13 = vpack.c.bf16 %v2266_v12, %v2266_v12 }
 0x921   : > { %826 = vrot.lane.b32.xlu1 %v824_v13, %s2062_s18 }
 0x96e   : > { %v654_v19 = vpop.permute.xlu0 %653 }
 0x96f   : > { %v656_v21 = vmul.f32 %v1965_v17, %v654_v19 }
 0x971   : > { %658 = vrot.lane.b32.xlu1 %v656_v21, %s2062_s18 }
 0x993   : > { %v827_v22 = vpop.permute.xlu1 %826 }
 0x994   : > { %1849 = vmatmul.mubr.msk.bf16.vlgmr.msra.gmra.mxu1 %vm272_vm2, %v827_v22 }
 0x995   : > { %1859 = vmatpush3.bf16.msra.mxu1 %v2129_v1  ;;  %1860 = vmatprep.mubr.msk.bf16.mxu1 %vm2058_vm1, %v2057_v2 }
 0x996   : > { %1870 = vmatprep.subr.bf16.mxu1 %v2057_v2 }
 0x9e3   : > { %v659_v24 = vpop.permute.xlu1 %658 }
 0x9e4   : > { %v2278_v25 = vadd.f32 %v659_v24, %v651_v23 }
 0x9e6   : > { %1966 = vtanh.f32 %v2278_v25 }
 0x9f3   : > { %v1967_v26 = vpop.eup %1966 }
 0x9f4   : > { %664 = vrot.lane.b32.xlu0 %v1967_v26, %s2064_s22 }
 0xa54   : > { %v865_v27 = vpop.f32.mrf.mxu1 }
 0xa55   : > { %872 = vrot.lane.b32.xlu1 %v865_v27, %s2060_s14 }
 0xa56   : > { %v1850_v28 = vpop.f32.mrf.mxu1 }
 0xa58   : > { %v868_v29 = vpop.f32.mrf.mxu1 }
 0xa5a   : > { %v1851_v30 = vpop.f32.mrf.mxu1 }
 0xa66   : > { %v665_v31 = vpop.permute.xlu0 %664 }
 0xa67   : > { %v2283_v32 = vmul.f32 %v1965_v17, %v665_v31 }
 0xa69   : > { %v750_v33 = vpack.c.bf16 %v2283_v32, %v2283_v32 }
 0xa6b   : > { %752 = vrot.lane.b32.xlu0 %v750_v33, %s2059_s13 }
 0xac7   : > { %v873_v35 = vpop.permute.xlu1 %872 }
 0xac8   : > { %v875_v36 = vadd.f32 %v1744_v34, %v873_v35 }
 0xaca   : > { %1968 = vtanh.f32 %v875_v36  ;;  %v1746_v41 = vmul.f32 -1.442695, %v875_v36  ;;  %v1747_v36 = vld [vmem:[%s2107_s23 + $0x8] sm:$0x3] }
 0xacc   : > { %1970 = vpow2.f32 %v1746_v41 }
 0xad7   : > { %v1969_v37 = vpop.eup %1968 }
 0xad8   : > { %885 = vrot.lane.b32.xlu1 %v1969_v37, %s2061_s17 }
 0xad9   : > { %v1971_v42 = vpop.eup %1970 }
 0xada   : > { %v879_v43 = vadd.f32 1.0, %v1971_v42 }
 0xadc   : > { %1972 = vrcp.f32 %v879_v43 }
 0xadd   : > { %v753_v40 = vpop.permute.xlu0 %752 }
 0xade   : > { %1843 = vmatmul.mubr.msk.bf16.vlgmr.msra.gmra.mxu0 %vm272_vm2, %v753_v40 }
 0xadf   : > { %1853 = vmatpush3.bf16.msra.mxu0 %v2152_v20  ;;  %1854 = vmatprep.mubr.msk.bf16.mxu0 %vm2058_vm1, %v2057_v2 }
 0xae0   : > { %1864 = vmatprep.subr.bf16.mxu0 %v2057_v2 }
 0xae9   : > { %v1973_v44 = vpop.eup %1972 }
 0xaea   : > { %v883_v53 = vmul.f32 %v1973_v44, %v2300_v52 }
 0xb4a   : > { %v886_v45 = vpop.permute.xlu1 %885 }
 0xb4b   : > { %v888_v46 = vmul.f32 %v1973_v44, %v886_v45 }
 0xb4d   : > { %890 = vrot.lane.b32.xlu0 %v888_v46, %s2062_s18 }
 0xb9e   : > { %v791_v47 = vpop.f32.mrf.mxu0 }
 0xb9f   : > { %v797_v57 = vadd.f32 %v1741_v54, %v791_v47 }
 0xba0   : > { %v1844_v48 = vpop.f32.mrf.mxu0 }
 0xba1   : > { %v1743_v61 = vmul.f32 -1.442695, %v797_v57 }
 0xba2   : > { %v794_v49 = vpop.f32.mrf.mxu0 }
 0xba4   : > { %v1845_v51 = vpop.f32.mrf.mxu0 }
 0xbbf   : > { %v891_v55 = vpop.permute.xlu0 %890 }
 0xbc0   : > { %v2304_v56 = vadd.f32 %v891_v55, %v883_v53 }
 0xbc2   : > { %1974 = vtanh.f32 %v2304_v56  ;;  %v2348_v46 = vsel %vm2171_vm3, %v2304_v56, %v2300_v52 }
 0xbc3   : > { %1976 = vtanh.f32 %v797_v57 }
 0xbc4   : > { %1978 = vpow2.f32 %v1743_v61 }
 0xbcf   : > { %v1975_v58 = vpop.eup %1974 }
 0xbd0   : > { %896 = vrot.lane.b32.xlu1 %v1975_v58, %s2064_s22  ;;  %v1977_v60 = vpop.eup %1976 }
 0xbd1   : > { %v1979_v59 = vpop.eup %1978 }
 0xbd2   : > { %v801_v62 = vadd.f32 1.0, %v1979_v59 }
 0xbd4   : > { %807 = vrot.lane.b32.xlu1 %v1977_v60, %s2061_s17  ;;  %1980 = vrcp.f32 %v801_v62 }
 0xbe1   : > { %v1981_v6 = vpop.eup %1980 }
 0xbe2   : > { %v805_v10 = vmul.f32 %v1981_v6, %v2278_v25  ;;  %v1750_v25 = vld [vmem:[%s2112_s27 + $0x6] sm:$0x3] }
 0xc42   : > { %v897_v63 = vpop.permute.xlu1 %896 }
 0xc43   : > { %v899_v0 = vmul.f32 %v1973_v44, %v897_v63 }
 0xc45   : > { %v2312_v3 = vsel %vm2171_vm3, %v899_v0, %v2266_v12 }
 0xc46   : > { %v978_v4 = vpack.c.bf16 %v2312_v3, %v2312_v3  ;;  %v808_v5 = vpop.permute.xlu1 %807 }
 0xc47   : > { %v810_v7 = vmul.f32 %v1981_v6, %v808_v5 }
 0xc48   : > { %980 = vrot.lane.b32.xlu0 %v978_v4, %s2062_s18 }
 0xc4c   : > { %812 = vrot.lane.b32.xlu0 %v810_v7, %s2062_s18 }
 0xcba   : > { %v981_v9 = vpop.permute.xlu0 %980 }
 0xcbb   : > { %1861 = vmatmul.mubr.msk.bf16.vlgmr.msra.gmra.mxu1 %vm272_vm2, %v981_v9 }
 0xcbc   : > { %1871 = vmatpush3.bf16.msra.mxu1 %v2129_v1  ;;  %1872 = vmatprep.mubr.msk.bf16.mxu1 %vm2058_vm1, %v2057_v2 }
 0xcbd   : > { %1882 = vmatprep.subr.bf16.mxu1 %v2057_v2 }
 0xcbe   : > { %v813_v11 = vpop.permute.xlu0 %812 }
 0xcbf   : > { %v2324_v13 = vadd.f32 %v813_v11, %v805_v10 }
 0xcc1   : > { %1982 = vtanh.f32 %v2324_v13 }
 0xcce   : > { %v1983_v14 = vpop.eup %1982 }
 0xccf   : > { %818 = vrot.lane.b32.xlu1 %v1983_v14, %s2064_s22 }
 0xd41   : > { %v819_v15 = vpop.permute.xlu1 %818 }
 0xd42   : > { %v2328_v16 = vmul.f32 %v1981_v6, %v819_v15  ;;  %v1756_v15 = vld [vmem:[%s2112_s27 + $0x4] sm:$0x3] }
 0xd44   : > { %v904_v17 = vpack.c.bf16 %v2328_v16, %v2328_v16 }
 0xd46   : > { %906 = vrot.lane.b32.xlu0 %v904_v17, %s2059_s13 }
 0xd7b   : > { %v1019_v19 = vpop.f32.mrf.mxu1 }
 0xd7c   : > { %1026 = vrot.lane.b32.xlu1 %v1019_v19, %s2060_s14 }
 0xd7d   : > { %v1862_v21 = vpop.f32.mrf.mxu1 }
 0xd7f   : > { %v1022_v22 = vpop.f32.mrf.mxu1 }
 0xd80   : > { %v1753_v22 = vld [vmem:[%s2107_s23 + $0xa] sm:$0x3] }
 0xd81   : > { %v1863_v23 = vpop.f32.mrf.mxu1 }
 0xdb8   : > { %v907_v24 = vpop.permute.xlu0 %906 }
 0xdb9   : > { %1855 = vmatmul.mubr.msk.bf16.vlgmr.msra.gmra.mxu0 %vm272_vm2, %v907_v24 }
 0xdba   : > { %1865 = vmatpush3.bf16.msra.mxu0 %v2152_v20  ;;  %1866 = vmatprep.mubr.msk.bf16.mxu0 %vm2058_vm1, %v2057_v2 }
 0xdbb   : > { %1876 = vmatprep.subr.bf16.mxu0 %v2057_v2 }
 0xdee   : > { %v1027_v26 = vpop.permute.xlu1 %1026 }
 0xdef   : > { %v1029_v27 = vadd.f32 %v1750_v25, %v1027_v26 }
 0xdf1   : > { %1984 = vtanh.f32 %v1029_v27  ;;  %v1752_v29 = vmul.f32 -1.442695, %v1029_v27 }
 0xdf3   : > { %1986 = vpow2.f32 %v1752_v29 }
 0xdfe   : > { %v1985_v28 = vpop.eup %1984 }
 0xdff   : > { %1039 = vrot.lane.b32.xlu0 %v1985_v28, %s2061_s17 }
 0xe00   : > { %v1987_v30 = vpop.eup %1986 }
 0xe01   : > { %v1033_v31 = vadd.f32 1.0, %v1987_v30 }
 0xe03   : > { %1988 = vrcp.f32 %v1033_v31 }
 0xe10   : > { %v1989_v33 = vpop.eup %1988 }
 0xe11   : > { %v1037_v47 = vmul.f32 %v1989_v33, %v2348_v46 }
 0xe71   : > { %v1040_v34 = vpop.permute.xlu0 %1039 }
 0xe72   : > { %v1042_v35 = vmul.f32 %v1989_v33, %v1040_v34 }
 0xe74   : > { %1044 = vrot.lane.b32.xlu1 %v1042_v35, %s2062_s18 }
 0xe79   : > { %v945_v37 = vpop.f32.mrf.mxu0 }
 0xe7a   : > { %v951_v40 = vadd.f32 %v1747_v36, %v945_v37 }
 0xe7b   : > { %v1856_v41 = vpop.f32.mrf.mxu0 }
 0xe7c   : > { %1990 = vtanh.f32 %v951_v40  ;;  %v1749_v45 = vmul.f32 -1.442695, %v951_v40 }
 0xe7d   : > { %v948_v42 = vpop.f32.mrf.mxu0 }
 0xe7e   : > { %1992 = vpow2.f32 %v1749_v45 }
 0xe7f   : > { %v1857_v43 = vpop.f32.mrf.mxu0 }
 0xe89   : > { %v1991_v44 = vpop.eup %1990 }
 0xe8a   : > { %961 = vrot.lane.b32.xlu1 %v1991_v44, %s2061_s17 }
 0xe8b   : > { %v1993_v51 = vpop.eup %1992 }
 0xe8c   : > { %v955_v53 = vadd.f32 1.0, %v1993_v51 }
 0xee6   : > { %v1045_v48 = vpop.permute.xlu1 %1044 }
 0xee7   : > { %v2351_v49 = vadd.f32 %v1045_v48, %v1037_v47 }
 0xee9   : > { %1994 = vtanh.f32 %v2351_v49  ;;  %v2395_v44 = vsel %vm2171_vm3, %v2351_v49, %v2348_v46 }
 0xeea   : > { %1996 = vrcp.f32 %v955_v53 }
 0xef6   : > { %v1995_v54 = vpop.eup %1994 }
 0xef7   : > { %1050 = vrot.lane.b32.xlu0 %v1995_v54, %s2064_s22  ;;  %v1997_v55 = vpop.eup %1996 }
 0xef8   : > { %v959_v59 = vmul.f32 %v1997_v55, %v2324_v13 }
 0xefc   : > { %v962_v57 = vpop.permute.xlu1 %961 }
 0xefd   : > { %v964_v58 = vmul.f32 %v1997_v55, %v962_v57 }
 0xeff   : > { %966 = vrot.lane.b32.xlu1 %v964_v58, %s2062_s18 }
 0xf69   : > { %v1051_v52 = vpop.permute.xlu0 %1050 }
 0xf6a   : > { %v1053_v56 = vmul.f32 %v1989_v33, %v1051_v52 }
 0xf6c   : > { %v2359_v60 = vsel %vm2171_vm3, %v1053_v56, %v2312_v3 }
 0xf6d   : > { %v1132_v61 = vpack.c.bf16 %v2359_v60, %v2359_v60 }
 0xf6f   : > { %1134 = vrot.lane.b32.xlu0 %v1132_v61, %s2062_s18 }
 0xf71   : > { %v967_v62 = vpop.permute.xlu1 %966 }
 0xf72   : > { %v2365_v63 = vadd.f32 %v967_v62, %v959_v59 }
 0xf74   : > { %1998 = vtanh.f32 %v2365_v63 }
 0xf81   : > { %v1999_v0 = vpop.eup %1998 }
 0xf82   : > { %972 = vrot.lane.b32.xlu0 %v1999_v0, %s2064_s22 }
 0xfe1   : > { %v1135_v4 = vpop.permute.xlu0 %1134 }
 0xfe2   : > { %1873 = vmatmul.mubr.msk.bf16.vlgmr.msra.gmra.mxu1 %vm272_vm2, %v1135_v4 }
 0xfe3   : > { %1883 = vmatpush3.bf16.msra.mxu1 %v2129_v1  ;;  %1884 = vmatprep.mubr.msk.bf16.mxu1 %vm2058_vm1, %v2057_v2 }
 0xfe4   : > { %1894 = vmatprep.subr.bf16.mxu1 %v2057_v2 }
 0xff4   : > { %v973_v5 = vpop.permute.xlu0 %972 }
 0xff5   : > { %v2374_v6 = vmul.f32 %v1997_v55, %v973_v5 }
 0xff7   : > { %v1058_v7 = vpack.c.bf16 %v2374_v6, %v2374_v6 }
 0xff9   : > { %1060 = vrot.lane.b32.xlu1 %v1058_v7, %s2059_s13 }
0x106b   : > { %v1061_v9 = vpop.permute.xlu1 %1060 }
0x106c   : > { %1867 = vmatmul.mubr.msk.bf16.vlgmr.msra.gmra.mxu0 %vm272_vm2, %v1061_v9 }
0x106d   : > { %1877 = vmatpush3.bf16.msra.mxu0 %v2152_v20  ;;  %1878 = vmatprep.mubr.msk.bf16.mxu0 %vm2058_vm1, %v2057_v2 }
0x106e   : > { %1888 = vmatprep.subr.bf16.mxu0 %v2057_v2 }
0x10a2   : > { %v1173_v10 = vpop.f32.mrf.mxu1 }
0x10a3   : > { %1180 = vrot.lane.b32.xlu0 %v1173_v10, %s2060_s14 }
0x10a4   : > { %v1874_v11 = vpop.f32.mrf.mxu1 }
0x10a6   : > { %v1176_v13 = vpop.f32.mrf.mxu1 }
0x10a7   : > { %v1762_v13 = vld [vmem:[%s2112_s27 + $0x2] sm:$0x3] }
0x10a8   : > { %v1875_v14 = vpop.f32.mrf.mxu1 }
0x10a9   : > { %v1759_v14 = vld [vmem:[%s2107_s23 + $0xc] sm:$0x3] }
0x1115   : > { %v1181_v17 = vpop.permute.xlu0 %1180 }
0x1116   : > { %v1183_v19 = vadd.f32 %v1756_v15, %v1181_v17 }
0x1118   : > { %2000 = vtanh.f32 %v1183_v19  ;;  %v1758_v29 = vmul.f32 -1.442695, %v1183_v19 }
0x1125   : > { %v2001_v21 = vpop.eup %2000 }
0x1126   : > { %1193 = vrot.lane.b32.xlu1 %v2001_v21, %s2061_s17 }
0x112c   : > { %v1099_v23 = vpop.f32.mrf.mxu0 }
0x112d   : > { %v1105_v24 = vadd.f32 %v1753_v22, %v1099_v23 }
0x112e   : > { %v1868_v25 = vpop.f32.mrf.mxu0 }
0x112f   : > { %2002 = vtanh.f32 %v1105_v24  ;;  %v1755_v33 = vmul.f32 -1.442695, %v1105_v24 }
0x1130   : > { %v1102_v26 = vpop.f32.mrf.mxu0  ;;  %2004 = vpow2.f32 %v1758_v29 }
0x1132   : > { %v1869_v27 = vpop.f32.mrf.mxu0 }
0x113c   : > { %v2003_v28 = vpop.eup %2002 }
0x113d   : > { %1115 = vrot.lane.b32.xlu1 %v2003_v28, %s2061_s17  ;;  %v2005_v30 = vpop.eup %2004 }
0x113e   : > { %v1187_v31 = vadd.f32 1.0, %v2005_v30 }
0x1140   : > { %2006 = vrcp.f32 %v1187_v31 }
0x1141   : > { %2008 = vpow2.f32 %v1755_v33 }
0x114d   : > { %v2007_v34 = vpop.eup %2006 }
0x114e   : > { %v2009_v37 = vpop.eup %2008  ;;  %v1191_v45 = vmul.f32 %v2007_v34, %v2395_v44 }
0x114f   : > { %v1109_v40 = vadd.f32 1.0, %v2009_v37 }
0x1151   : > { %2010 = vrcp.f32 %v1109_v40 }
0x115e   : > { %v2011_v41 = vpop.eup %2010 }
0x115f   : > { %v1113_v53 = vmul.f32 %v2011_v41, %v2365_v63 }
0x1198   : > { %v1194_v35 = vpop.permute.xlu1 %1193 }
0x1199   : > { %v1196_v36 = vmul.f32 %v2007_v34, %v1194_v35 }
0x119b   : > { %1198 = vrot.lane.b32.xlu0 %v1196_v36, %s2062_s18 }
0x11af   : > { %v1116_v42 = vpop.permute.xlu1 %1115 }
0x11b0   : > { %v1118_v43 = vmul.f32 %v2011_v41, %v1116_v42 }
0x11b2   : > { %1120 = vrot.lane.b32.xlu1 %v1118_v43, %s2062_s18 }
0x120d   : > { %v1199_v47 = vpop.permute.xlu0 %1198 }
0x120e   : > { %v2398_v48 = vadd.f32 %v1199_v47, %v1191_v45 }
0x1210   : > { %2012 = vtanh.f32 %v2398_v48 }
0x121d   : > { %v2013_v51 = vpop.eup %2012 }
0x121e   : > { %1204 = vrot.lane.b32.xlu0 %v2013_v51, %s2064_s22 }
0x1224   : > { %v1121_v54 = vpop.permute.xlu1 %1120 }
0x1225   : > { %v2403_v55 = vadd.f32 %v1121_v54, %v1113_v53 }
0x1227   : > { %2014 = vtanh.f32 %v2403_v55 }
0x1234   : > { %v2015_v57 = vpop.eup %2014 }
0x1235   : > { %1126 = vrot.lane.b32.xlu1 %v2015_v57, %s2064_s22 }
0x1290   : > { %v1205_v46 = vpop.permute.xlu0 %1204 }
0x1291   : > { %v1207_v49 = vmul.f32 %v2007_v34, %v1205_v46  ;;  %v2439_v34 = vsel %vm2171_vm3, %v2398_v48, %v2395_v44 }
0x1293   : > { %v2410_v58 = vsel %vm2171_vm3, %v1207_v49, %v2359_v60 }
0x1294   : > { %v1286_v52 = vpack.c.bf16 %v2410_v58, %v2410_v58 }
0x1296   : > { %1288 = vrot.lane.b32.xlu0 %v1286_v52, %s2062_s18 }
0x12a7   : > { %v1127_v56 = vpop.permute.xlu1 %1126 }
0x12a8   : > { %v2415_v61 = vmul.f32 %v2011_v41, %v1127_v56  ;;  %v1765_v56 = vld [vmem:[%s2107_s23 + $0xe] sm:$0x3] }
0x12aa   : > { %v1212_v59 = vpack.c.bf16 %v2415_v61, %v2415_v61 }
0x12ac   : > { %1214 = vrot.lane.b32.xlu0 %v1212_v59, %s2059_s13 }
0x1308   : > { %v1289_v62 = vpop.permute.xlu0 %1288 }
0x1309   : > { %1885 = vmatmul.mubr.msk.bf16.vlgmr.msra.gmra.mxu1 %vm272_vm2, %v1289_v62 }
0x130a   : > { %1895 = vmatpush3.bf16.msra.mxu1 %v2129_v1  ;;  %1896 = vmatprep.mubr.msk.bf16.mxu1 %vm2058_vm1, %v2057_v2 }
0x131e   : > { %v1215_v63 = vpop.permute.xlu0 %1214 }
0x131f   : > { %1879 = vmatmul.mubr.msk.bf16.vlgmr.msra.gmra.mxu0 %vm272_vm2, %v1215_v63 }
0x1320   : > { %1889 = vmatpush3.bf16.msra.mxu0 %v2152_v20  ;;  %1890 = vmatprep.mubr.msk.bf16.mxu0 %vm2058_vm1, %v2057_v2 }
0x13c9   : > { %v1327_v0 = vpop.f32.mrf.mxu1 }
0x13ca   : > { %1334 = vrot.lane.b32.xlu1 %v1327_v0, %s2060_s14 }
0x13cb   : > { %v1886_v4 = vpop.f32.mrf.mxu1 }
0x13cd   : > { %v1330_v5 = vpop.f32.mrf.mxu1 }
0x13cf   : > { %v1887_v7 = vpop.f32.mrf.mxu1 }
0x13df   : > { %v1253_v9 = vpop.f32.mrf.mxu0 }
0x13e0   : > { %v1259_v19 = vadd.f32 %v1759_v14, %v1253_v9 }
0x13e1   : > { %v1880_v1 = vpop.f32.mrf.mxu0 }
0x13e2   : > { %v1761_v22 = vmul.f32 -1.442695, %v1259_v19 }
0x13e3   : > { %v1256_v10 = vpop.f32.mrf.mxu0 }
0x13e4   : > { %v1438_v10 = vld [vmem:[%s2112_s27] sm:$0x3] }
0x13e5   : > { %v1881_v11 = vpop.f32.mrf.mxu0 }
0x143c   : > { %v1335_v15 = vpop.permute.xlu1 %1334 }
0x143d   : > { %v1337_v17 = vadd.f32 %v1762_v13, %v1335_v15 }
0x143f   : > { %2016 = vtanh.f32 %v1337_v17  ;;  %v1764_v21 = vmul.f32 -1.442695, %v1337_v17 }
0x1440   : > { %2018 = vtanh.f32 %v1259_v19 }
0x1441   : > { %2020 = vpow2.f32 %v1764_v21 }
0x1442   : > { %2022 = vpow2.f32 %v1761_v22 }
0x144c   : > { %v2017_v20 = vpop.eup %2016 }
0x144d   : > { %1347 = vrot.lane.b32.xlu0 %v2017_v20, %s2061_s17  ;;  %v2019_v2 = vpop.eup %2018 }
0x144e   : > { %v2021_v23 = vpop.eup %2020 }
0x144f   : > { %v1341_v24 = vadd.f32 1.0, %v2021_v23  ;;  %v2023_v25 = vpop.eup %2022 }
0x1450   : > { %v1263_v26 = vadd.f32 1.0, %v2023_v25 }
0x1451   : > { %1269 = vrot.lane.b32.xlu0 %v2019_v2, %s2061_s17  ;;  %2024 = vrcp.f32 %v1341_v24 }
0x1452   : > { %2026 = vrcp.f32 %v1263_v26 }
0x145e   : > { %v2025_v27 = vpop.eup %2024 }
0x145f   : > { %v2027_v30 = vpop.eup %2026  ;;  %v1345_v35 = vmul.f32 %v2025_v27, %v2439_v34 }
0x1460   : > { %v1267_v40 = vmul.f32 %v2027_v30, %v2403_v55 }
0x14bf   : > { %v1348_v28 = vpop.permute.xlu0 %1347 }
0x14c0   : > { %v1350_v29 = vmul.f32 %v2025_v27, %v1348_v28 }
0x14c2   : > { %1352 = vrot.lane.b32.xlu1 %v1350_v29, %s2062_s18 }
0x14c3   : > { %v1270_v31 = vpop.permute.xlu0 %1269 }
0x14c4   : > { %v1272_v33 = vmul.f32 %v2027_v30, %v1270_v31 }
0x14c6   : > { %1274 = vrot.lane.b32.xlu1 %v1272_v33, %s2062_s18 }
0x1534   : > { %v1353_v36 = vpop.permute.xlu1 %1352 }
0x1535   : > { %v2442_v37 = vadd.f32 %v1353_v36, %v1345_v35 }
0x1537   : > { %2028 = vtanh.f32 %v2442_v37  ;;  %v1363_v31 = vsel %vm2171_vm3, %v2442_v37, %v2439_v34 }
0x1538   : > { %v1275_v41 = vpop.permute.xlu1 %1274 }
0x1539   : > { %v1277_v42 = vadd.f32 %v1275_v41, %v1267_v40 }
0x153b   : > { %2030 = vtanh.f32 %v1277_v42 }
0x1544   : > { %v2029_v43 = vpop.eup %2028 }
0x1545   : > { %1358 = vrot.lane.b32.xlu0 %v2029_v43, %s2064_s22 }
0x1548   : > { %v2031_v45 = vpop.eup %2030 }
0x1549   : > { %1280 = vrot.lane.b32.xlu0 %v2031_v45, %s2064_s22 }
0x15b7   : > { %v1359_v44 = vpop.permute.xlu0 %1358 }
0x15b8   : > { %v1361_v47 = vmul.f32 %v2025_v27, %v1359_v44 }
0x15ba   : > { %v1362_v48 = vsel %vm2171_vm3, %v1361_v47, %v2410_v58 }
0x15bb   : > { %v1281_v51 = vpop.permute.xlu0 %1280  ;;  %v1439_v53 = vpack.c.bf16 %v1362_v48, %v1362_v48 }
0x15bc   : > { %v1283_v54 = vmul.f32 %v2027_v30, %v1281_v51 }
0x15bd   : > { %1441 = vrot.lane.b32.xlu1 %v1439_v53, %s2062_s18 }
0x15be   : > { %v1366_v55 = vpack.c.bf16 %v1283_v54, %v1283_v54 }
0x15c1   : > { %1368 = vrot.lane.b32.xlu1 %v1366_v55, %s2059_s13 }
0x162f   : > { %v1442_v57 = vpop.permute.xlu1 %1441 }
0x1630   : > { %1897 = vmatmul.mubr.msk.bf16.vlgmr.msra.gmra.mxu1 %vm272_vm2, %v1442_v57 }
0x1633   : > { %v1369_v46 = vpop.permute.xlu1 %1368 }
0x1634   : > { %1891 = vmatmul.mubr.msk.bf16.vlgmr.msra.gmra.mxu0 %vm272_vm2, %v1369_v46 }
0x16f0   : > { %v1480_v49 = vpop.f32.mrf.mxu1 }
0x16f1   : > { %1487 = vrot.lane.b32.xlu0 %v1480_v49, %s2060_s14 }
0x16f2   : > { %v1898_v52 = vpop.f32.mrf.mxu1 }
0x16f4   : > { %v1407_v59 = vpop.f32.mrf.mxu0  ;;  %v1483_v62 = vpop.f32.mrf.mxu1 }
0x16f5   : > { %v1413_v63 = vadd.f32 %v1765_v56, %v1407_v59 }
0x16f6   : > { %v1892_v0 = vpop.f32.mrf.mxu0  ;;  %v1899_v4 = vpop.f32.mrf.mxu1 }
0x16f7   : > { %2032 = vtanh.f32 %v1413_v63  ;;  %v1767_v1 = vmul.f32 -1.442695, %v1413_v63 }
0x16f8   : > { %v1410_v5 = vpop.f32.mrf.mxu0 }
0x16f9   : > { %2034 = vpow2.f32 %v1767_v1 }
0x16fa   : > { %v1893_v7 = vpop.f32.mrf.mxu0 }
0x1704   : > { %v2033_v9 = vpop.eup %2032 }
0x1705   : > { %1423 = vrot.lane.b32.xlu0 %v2033_v9, %s2061_s17 }
0x1706   : > { %v2035_v11 = vpop.eup %2034 }
0x1707   : > { %v1417_v15 = vadd.f32 1.0, %v2035_v11 }
0x1763   : > { %v1488_v13 = vpop.permute.xlu0 %1487 }
0x1764   : > { %v1490_v14 = vadd.f32 %v1488_v13, %v1438_v10 }
0x1766   : > { %2036 = vtanh.f32 %v1490_v14  ;;  %v1769_v21 = vmul.f32 -1.442695, %v1490_v14 }
0x1767   : > { %2038 = vrcp.f32 %v1417_v15 }
0x1768   : > { %2040 = vpow2.f32 %v1769_v21 }
0x1773   : > { %v2037_v17 = vpop.eup %2036 }
0x1774   : > { %1500 = vrot.lane.b32.xlu1 %v2037_v17, %s2061_s17  ;;  %v2039_v19 = vpop.eup %2038 }
0x1775   : > { %v2041_v22 = vpop.eup %2040  ;;  %v1421_v27 = vmul.f32 %v2039_v19, %v1277_v42 }
0x1776   : > { %v1494_v23 = vadd.f32 1.0, %v2041_v22 }
0x1777   : > { %v1424_v20 = vpop.permute.xlu0 %1423 }
0x1778   : > { %v1426_v2 = vmul.f32 %v2039_v19, %v1424_v20  ;;  %2042 = vrcp.f32 %v1494_v23 }
0x177a   : > { %1428 = vrot.lane.b32.xlu0 %v1426_v2, %s2062_s18 }
0x1785   : > { %v2043_v24 = vpop.eup %2042 }
0x17e6   : > { %v1501_v25 = vpop.permute.xlu1 %1500 }
0x17e7   : > { %v1503_v26 = vmul.f32 %v2043_v24, %v1501_v25 }
0x17e9   : > { %1505 = vrot.lane.b32.xlu1 %v1503_v26, %s2062_s18 }
0x17ec   : > { %v1429_v28 = vpop.permute.xlu0 %1428 }
0x17ed   : > { %v1431_v29 = vadd.f32 %v1429_v28, %v1421_v27 }
0x17ef   : > { %2044 = vtanh.f32 %v1431_v29 }
0x17fc   : > { %v2045_v30 = vpop.eup %2044 }
0x17fd   : > { %1434 = vrot.lane.b32.xlu0 %v2045_v30, %s2064_s22 }
0x1801   : > { %1520 = vrot.lane.b32.xlu0 %v2239_v50, %s2061_s17  ;;  %v1498_v50 = vmul.f32 %v2043_v24, %v1363_v31 }
0x1805   : > { %1562 = vrot.lane.b32.xlu0 %v1362_v48, %s2064_s22 }
0x1809   : > { %1566 = vrot.lane.b32.xlu0 %v2410_v58, %s2065_s16 }
0x180d   : > { %1528 = vrot.lane.b32.xlu0 %v2374_v6, %s2062_s18 }
0x1811   : > { %1532 = vrot.lane.b32.xlu0 %v2415_v61, %s2064_s22 }
0x1815   : > { %1536 = vrot.lane.b32.xlu0 %v1283_v54, %s2065_s16 }
0x185b   : > { %v1506_v33 = vpop.permute.xlu1 %1505 }
0x185c   : > { %v1508_v35 = vadd.f32 %v1506_v33, %v1498_v50 }
0x185e   : > { %2046 = vtanh.f32 %v1508_v35 }
0x186b   : > { %v2047_v36 = vpop.eup %2046 }
0x186c   : > { %1511 = vrot.lane.b32.xlu1 %v2047_v36, %s2064_s22 }
0x186f   : > { %v1435_v58 = vpop.permute.xlu0 %1434 }
0x1870   : > { %v1437_v40 = vmul.f32 %v2039_v19, %v1435_v58  ;;  %1516 = vrot.lane.b32.xlu1 %v2195_v8, %s2059_s13 }
0x1872   : > { %1540 = vrot.lane.b32.xlu0 %v1437_v40, %s2060_s14 }
0x1873   : > { %v1521_v38 = vpop.permute.xlu0 %1520 }
0x1874   : > { %1524 = vrot.lane.b32.xlu1 %v2283_v32, %s2063_s21 }
0x1876   : > { %1599 = vrot.lane.b32.xlu0 %v1431_v29, %s2063_s21 }
0x1877   : > { %v1563_v8 = vpop.permute.xlu0 %1562 }
0x1878   : > { %1570 = vrot.lane.b32.xlu1 %v2359_v60, %s2060_s14 }
0x187b   : > { %v1567_v6 = vpop.permute.xlu0 %1566 }
0x187c   : > { %1574 = vrot.lane.b32.xlu1 %v2312_v3, %s2059_s13 }
0x187f   : > { %v1529_v61 = vpop.permute.xlu0 %1528 }
0x1880   : > { %1578 = vrot.lane.b32.xlu1 %v2266_v12, %s2061_s17 }
0x1883   : > { %v1533_v34 = vpop.permute.xlu0 %1532 }
0x1884   : > { %1582 = vrot.lane.b32.xlu1 %v2219_v18, %s2063_s21 }
0x1887   : > { %v1537_v41 = vpop.permute.xlu0 %1536 }
0x18de   : > { %v1512_v32 = vpop.permute.xlu1 %1511 }
0x18df   : > { %v1514_v37 = vmul.f32 %v2043_v24, %v1512_v32 }
0x18e1   : > { %1558 = vrot.lane.b32.xlu1 %v1514_v37, %s2062_s18 }
0x18e2   : > { %v1517_v60 = vpop.permute.xlu1 %1516 }
0x18e3   : > { %v1543_v12 = vsel %vm272_vm2, %v1517_v60, %v1521_v38 }
0x18e4   : > { %v1541_v42 = vpop.permute.xlu0 %1540 }
0x18e5   : > { %1593 = vrot.lane.b32.xlu1 %v1437_v40, %s2059_s13 }
0x18e6   : > { %v1525_v18 = vpop.permute.xlu1 %1524 }
0x18e7   : > { %v1545_v3 = vsel %vm1544_vm4, %v1543_v12, %v1525_v18 }
0x18e8   : > { %v1547_v43 = vsel %vm1546_vm5, %v1545_v3, %v2328_v16  ;;  %v1600_v45 = vpop.permute.xlu0 %1599 }
0x18e9   : > { %v1549_v44 = vsel %vm1548_vm6, %v1547_v43, %v1529_v61  ;;  %1602 = vst.msk [vmem:[#allocation3] sm:$0x3] %vm1596_vm7, %v1600_v45  ;;  %1605 = vrot.lane.b32.xlu1 %v1508_v35, %s2065_s16 }
0x18ea   : > { %v1551_v47 = vsel %vm1550_vm8, %v1549_v44, %v1533_v34  ;;  %v1571_v53 = vpop.permute.xlu1 %1570 }
0x18eb   : > { %v1553_v48 = vsel %vm1552_vm9, %v1551_v47, %v1537_v41 }
0x18ec   : > { %v1555_v51 = vsel %vm1554_vm10, %v1553_v48, %v1541_v42 }
0x18ed   : > { %1556 = vst [vmem:[%s2118_s6] sm:$0x3] %v1555_v51 }
0x18ee   : > { %v1575_v54 = vpop.permute.xlu1 %1574 }
0x18f2   : > { %v1579_v55 = vpop.permute.xlu1 %1578 }
0x18f6   : > { %v1583_v16 = vpop.permute.xlu1 %1582 }
0x1953   : > { %v1559_v57 = vpop.permute.xlu1 %1558 }
0x1954   : > { %v1585_v46 = vsel %vm272_vm2, %v1559_v57, %v1563_v8  ;;  %1603 = vst.msk [vmem:[#allocation2 + $0x2] sm:$0x3] %vm1596_vm7, %v1559_v57 }
0x1955   : > { %v1586_v49 = vsel %vm1544_vm4, %v1585_v46, %v1567_v6 }
0x1956   : > { %v1587_v52 = vsel %vm1546_vm5, %v1586_v49, %v1571_v53 }
0x1957   : > { %v1588_v56 = vsel %vm1548_vm6, %v1587_v52, %v1575_v54  ;;  %v1594_v59 = vpop.permute.xlu1 %1593 }
0x1958   : > { %v1589_v62 = vsel %vm1550_vm8, %v1588_v56, %v1579_v55  ;;  %1597 = vst.msk [vmem:[#allocation2] sm:$0x3] %vm1596_vm7, %v1594_v59 }
0x1959   : > { %v1590_v63 = vsel %vm1552_vm9, %v1589_v62, %v1583_v16 }
0x195a   : > { %v1591_v0 = vsel %vm1554_vm10, %v1590_v63, %v2177_v39 }
0x195b   : > { %1592 = vst [vmem:[%s2123_s10] sm:$0x3] %v1591_v0  ;;  %v1606_v4 = vpop.permute.xlu1 %1605 }
0x195c   : > { %1608 = vst.msk [vmem:[#allocation3 + $0x2] sm:$0x3] %vm1596_vm7, %v1606_v4 }
0x195d PF: > { %s15_s15 = sadd.s32 1, %s2054_s15  }
0x195e   : > { %p12_p9 = scmp.ge.s32.totalorder %s15_s15, 5  }
0x1960   :  { %14 = sbr.rel (!%p12_p9) target bundleno = 1 (0x1), region = 98 }

</bundles_post_ra>
